<compile_context>
chip_gen: v5e
topology: v5e:2x2
jax: 0.10.0
libtpu: 0.0.40
codegen_flags: <defaults>
</compile_context>

<pallas_src>
import jax
import jax.numpy as jnp
import numpy as np
from jax.experimental import pallas as pl
from jax.experimental.pallas import tpu as pltpu

# --- static configuration (small shapes consistent with the module) --------
B = 2                         # batch_size
L = 16                        # max_word_length (tokens per document)
V = 50                        # vocab size of the synthetic "word2vec"
E = 32                        # embedding dim
NF = 8                        # n_filters
FILTER_SIZES = (2, 3)         # filter_sizes      (word-level CNN)
FUSE_SIZES = (2, 3)           # filter_sizes_fuse (fusion CNN over the 7 docs)
C = 4                         # num_classes
SEQ = 7                       # before3, before2, before1, title, after1..3
F = NF * len(FILTER_SIZES)    # per-doc feature dim        = 16
FF = NF * len(FUSE_SIZES)     # fused feature dim          = 16
C2 = 2 * NF                   # combined conv channels (fs=2 cols | fs=3 cols)

FS_MAX = max(FILTER_SIZES)    # 3
FU_MAX = max(FUSE_SIZES)      # 3
N = SEQ * B * L               # 224 flat token rows (doc-major, batch, word)
NPAD = N + 8                  # zero-padded rows so shifted slices stay in range
G = SEQ * B                   # 14 (doc, batch) groups
GPAD = G + (FU_MAX - 1) * B   # 18 padded rows for the fusion-conv shifts
KW = FS_MAX * E               # 96  im2col K for the word conv
KF = FU_MAX * F               # 48  im2col K for the fusion conv


# ----------------------------- fused Pallas kernel --------------------------
def hier_kernel(tok_ref, emb_ref, wword_ref, bword_ref,
                wfuse_ref, bfuse_ref, fcw_ref, fcb_ref, out_ref):
    """One invocation: embed -> word CNN (7 docs) -> fusion CNN -> FC.

    tok_ref  : (N, 1)    int32  flat token ids (doc-major, then batch, then word)
    emb_ref  : (V, E)    f32    embedding table
    wword_ref: (KW, C2)  f32    combined im2col word-conv weights (fs=2 | fs=3)
    bword_ref: (1, C2)   f32
    wfuse_ref: (KF, C2)  f32    combined im2col fusion-conv weights
    bfuse_ref: (1, C2)   f32
    fcw_ref  : (FF, C)   f32 ;  fcb_ref: (1, C)
    out_ref  : (B, C)    f32
    """
    # ---- embedding lookup via exact one-hot matmul (1 MXU push) ----
    tok = tok_ref[...]                                            # (N, 1) int32
    vocab_iota = jax.lax.broadcasted_iota(jnp.int32, (N, V), 1)   # (N, V)
    onehot = (tok == vocab_iota).astype(jnp.float32)              # exact 0/1
    emb = jnp.dot(onehot, emb_ref[...],
                  preferred_element_type=jnp.float32)             # (N, E)

    # ---- word-level conv, both filter sizes, all docs: ONE matmul ----
    embp = jnp.concatenate(
        [emb, jnp.zeros((NPAD - N, E), jnp.float32)], axis=0)     # (NPAD, E)
    x = jnp.concatenate([embp[o:o + N, :] for o in range(FS_MAX)],
                        axis=-1)                                  # (N, KW)
    conv = jnp.dot(x, wword_ref[...],
                   preferred_element_type=jnp.float32)            # (N, C2)
    act = jnp.maximum(conv + bword_ref[...], 0.0)
    # mask window positions that cross a document boundary (per filter size)
    row = jax.lax.broadcasted_iota(jnp.int32, (N, C2), 0)
    col = jax.lax.broadcasted_iota(jnp.int32, (N, C2), 1)
    pos = jnp.bitwise_and(row, L - 1)                             # word pos (L=16)
    limit = jnp.where(col < NF,
                      L - FILTER_SIZES[0] + 1, L - FILTER_SIZES[1] + 1)
    act = jnp.where(pos < limit, act, 0.0)                        # relu >= 0

    # ---- max-over-time per (doc, batch) group -> per-doc features (G, F) ----
    feats = jnp.concatenate(
        [jnp.max(act[g * L:(g + 1) * L, :], axis=0, keepdims=True)
         for g in range(G)], axis=0)                              # (G, F)

    # ---- fusion conv over the 7-doc axis, both fuse sizes: ONE matmul ----
    featp = jnp.concatenate(
        [feats, jnp.zeros((GPAD - G, F), jnp.float32)], axis=0)   # (GPAD, F)
    x2 = jnp.concatenate([featp[o * B:o * B + G, :] for o in range(FU_MAX)],
                         axis=-1)                                 # (G, KF)
    conv2 = jnp.dot(x2, wfuse_ref[...],
                    preferred_element_type=jnp.float32)           # (G, C2)
    act2 = jnp.maximum(conv2 + bfuse_ref[...], 0.0)
    row2 = jax.lax.broadcasted_iota(jnp.int32, (G, C2), 0)
    col2 = jax.lax.broadcasted_iota(jnp.int32, (G, C2), 1)
    limit2 = jnp.where(col2 < NF,
                       (SEQ - FUSE_SIZES[0] + 1) * B,
                       (SEQ - FUSE_SIZES[1] + 1) * B)
    act2 = jnp.where(row2 < limit2, act2, 0.0)

    # ---- max over doc positions per batch element -> (B, FF) ----
    pooled = act2[0:B, :]
    for p in range(1, SEQ):
        pooled = jnp.maximum(pooled, act2[p * B:(p + 1) * B, :])

    # ---- final FC ----
    out_ref[...] = (jnp.dot(pooled, fcw_ref[...],
                            preferred_element_type=jnp.float32)
                    + fcb_ref[...])


# ------------------------------- wrapper ------------------------------------
def hier_att_net_forward(tokens, params):
    """tokens: (SEQ, B, L) int32, doc order
       [before3, before2, before1, title, after1, after2, after3]."""
    tok_flat = tokens.reshape(N, 1).astype(jnp.int32)

    # Build combined im2col weights/biases (tiny one-time glue in plain JAX).
    w2f = params["w2"].reshape(FILTER_SIZES[0] * E, NF)
    w3f = params["w3"].reshape(FILTER_SIZES[1] * E, NF)
    wword = jnp.concatenate(
        [jnp.concatenate(
            [w2f, jnp.zeros(((FS_MAX - FILTER_SIZES[0]) * E, NF), jnp.float32)],
            axis=0),
         w3f], axis=1)                                            # (KW, C2)
    bword = jnp.concatenate([params["b2"], params["b3"]], axis=1)  # (1, C2)

    fw2f = params["fw2"].reshape(FUSE_SIZES[0] * F, NF)
    fw3f = params["fw3"].reshape(FUSE_SIZES[1] * F, NF)
    wfuse = jnp.concatenate(
        [jnp.concatenate(
            [fw2f, jnp.zeros(((FU_MAX - FUSE_SIZES[0]) * F, NF), jnp.float32)],
            axis=0),
         fw3f], axis=1)                                           # (KF, C2)
    bfuse = jnp.concatenate([params["fb2"], params["fb3"]], axis=1)

    return pl.pallas_call(
        hier_kernel,
        in_specs=[pl.BlockSpec(memory_space=pltpu.MemorySpace.VMEM)] * 8,
        out_specs=pl.BlockSpec(memory_space=pltpu.MemorySpace.VMEM),
        out_shape=jax.ShapeDtypeStruct((B, C), jnp.float32),
    )(tok_flat, params["emb"], wword, bword, wfuse, bfuse,
      params["fcw"], params["fcb"])


# ----------------------------- pure-JAX reference ---------------------------
def reference_forward(tokens, params):
    emb_docs = params["emb"][tokens].astype(jnp.float32)          # (SEQ, B, L, E)
    feats = []
    for d in range(SEQ):
        emb = emb_docs[d]                                         # (B, L, E)
        pooled_all = []
        for w, b, fs in ((params["w2"], params["b2"], FILTER_SIZES[0]),
                         (params["w3"], params["b3"], FILTER_SIZES[1])):
            P = L - fs + 1
            acc = jnp.zeros((B, P, NF), jnp.float32)
            for o in range(fs):
                acc = acc + jnp.einsum("bpe,en->bpn", emb[:, o:o + P, :], w[o])
            act = jnp.maximum(acc + b[0], 0.0)
            pooled_all.append(jnp.max(act, axis=1))
        feats.append(jnp.concatenate(pooled_all, axis=-1))
    feats = jnp.stack(feats, axis=0)                              # (SEQ, B, F)
    pooled_all = []
    for w, b, fs in ((params["fw2"], params["fb2"], FUSE_SIZES[0]),
                     (params["fw3"], params["fb3"], FUSE_SIZES[1])):
        P = SEQ - fs + 1
        acc = jnp.zeros((P, B, NF), jnp.float32)
        for o in range(fs):
            acc = acc + jnp.einsum("pbf,fn->pbn", feats[o:o + P], w[o])
        act = jnp.maximum(acc + b[0], 0.0)
        pooled_all.append(jnp.max(act, axis=0))
    fused = jnp.concatenate(pooled_all, axis=-1)                  # (B, FF)
    return jnp.dot(fused, params["fcw"]) + params["fcb"]


# --------------------------- parameter construction --------------------------
def init_params(key):
    ks = jax.random.split(key, 11)

    def nrm(k, shape, scale=0.1):
        return (scale * jax.random.normal(k, shape)).astype(jnp.float32)

    return dict(
        emb=nrm(ks[0], (V, E), 1.0),                              # synthetic word2vec
        w2=nrm(ks[1], (FILTER_SIZES[0], E, NF)), b2=nrm(ks[2], (1, NF)),
        w3=nrm(ks[3], (FILTER_SIZES[1], E, NF)), b3=nrm(ks[4], (1, NF)),
        fw2=nrm(ks[5], (FUSE_SIZES[0], F, NF)), fb2=nrm(ks[6], (1, NF)),
        fw3=nrm(ks[7], (FUSE_SIZES[1], F, NF)), fb3=nrm(ks[8], (1, NF)),
        fcw=nrm(ks[9], (FF, C)), fcb=nrm(ks[10], (1, C)),
    )


if __name__ == "__main__":
    key = jax.random.PRNGKey(0)
    k_tok, k_par = jax.random.split(key)
    doc_keys = jax.random.split(k_tok, SEQ)
    # Token-id inputs for [before3, before2, before1, title, after1, after2, after3]
    tokens = jnp.stack(
        [jax.random.randint(doc_keys[i], (B, L), 0, V) for i in range(SEQ)],
        axis=0).astype(jnp.int32)                                 # (SEQ, B, L)
    params = init_params(k_par)

    out = hier_att_net_forward(tokens, params)
    out = jax.block_until_ready(out)
    assert out.shape == (B, C)

    ref = reference_forward(tokens, params)
    np.testing.assert_allclose(np.asarray(out), np.asarray(ref),
                               rtol=1e-4, atol=1e-4)
    # TODO(synk): dropout layers omitted (identity at inference); unused
    # WordAttNet/SentAttNet/TotalNet branches are not part of forward().
    print("KERNEL_OK")
</pallas_src>

<mosaic_0001>
module attributes {stable_mosaic.version = 11 : i64} {
  func.func @hier_kernel(%arg0: memref<224x1xi32, #tpu.memory_space<vmem>>, %arg1: memref<50x32xf32, #tpu.memory_space<vmem>>, %arg2: memref<96x16xf32, #tpu.memory_space<vmem>>, %arg3: memref<1x16xf32, #tpu.memory_space<vmem>>, %arg4: memref<48x16xf32, #tpu.memory_space<vmem>>, %arg5: memref<1x16xf32, #tpu.memory_space<vmem>>, %arg6: memref<16x4xf32, #tpu.memory_space<vmem>>, %arg7: memref<1x4xf32, #tpu.memory_space<vmem>>, %arg8: memref<2x4xf32, #tpu.memory_space<vmem>>) attributes {dimension_semantics = [], scalar_prefetch = 0 : i64, scratch_operands = 0 : i64, tpu.core_type = #tpu.core_type<tc>} {
    %c0 = arith.constant 0 : index
    %c0_0 = arith.constant 0 : index
    %0 = vector.load %arg0[%c0, %c0_0] : memref<224x1xi32, #tpu.memory_space<vmem>>, vector<224x1xi32>
    %1 = tpu.iota {dimensions = array<i32: 1>} : vector<224x50xi32>
    %2 = vector.broadcast %0 : vector<224x1xi32> to vector<224x50xi32>
    %3 = arith.cmpi eq, %2, %1 : vector<224x50xi32>
    %4 = arith.extui %3 : vector<224x50xi1> to vector<224x50xi32>
    %5 = arith.sitofp %4 : vector<224x50xi32> to vector<224x50xf32>
    %c0_1 = arith.constant 0 : index
    %c0_2 = arith.constant 0 : index
    %6 = vector.load %arg1[%c0_1, %c0_2] : memref<50x32xf32, #tpu.memory_space<vmem>>, vector<50x32xf32>
    %cst = arith.constant dense<0.000000e+00> : vector<224x32xf32>
    %7 = tpu.matmul %5, %6, %cst {dimension_numbers = #tpu.dot_dimension_numbers<[1], [0], [0], [1], [0, 0, 1, 1], [], []>} : vector<224x50xf32>, vector<50x32xf32>, vector<224x32xf32> -> vector<224x32xf32>
    %cst_3 = arith.constant 0.000000e+00 : f32
    %8 = vector.broadcast %cst_3 : f32 to vector<8x32xf32>
    %9 = tpu.concatenate %7, %8 in 0 : vector<224x32xf32>, vector<8x32xf32> -> vector<232x32xf32>
    %10 = vector.extract_strided_slice %9 {offsets = [0, 0], sizes = [224, 32], strides = [1, 1]} : vector<232x32xf32> to vector<224x32xf32>
    %11 = vector.extract_strided_slice %9 {offsets = [1, 0], sizes = [224, 32], strides = [1, 1]} : vector<232x32xf32> to vector<224x32xf32>
    %12 = vector.extract_strided_slice %9 {offsets = [2, 0], sizes = [224, 32], strides = [1, 1]} : vector<232x32xf32> to vector<224x32xf32>
    %13 = tpu.concatenate %10, %11, %12 in 1 : vector<224x32xf32>, vector<224x32xf32>, vector<224x32xf32> -> vector<224x96xf32>
    %c0_4 = arith.constant 0 : index
    %c0_5 = arith.constant 0 : index
    %14 = vector.load %arg2[%c0_4, %c0_5] : memref<96x16xf32, #tpu.memory_space<vmem>>, vector<96x16xf32>
    %cst_6 = arith.constant dense<0.000000e+00> : vector<224x16xf32>
    %15 = tpu.matmul %13, %14, %cst_6 {dimension_numbers = #tpu.dot_dimension_numbers<[1], [0], [0], [1], [0, 0, 1, 1], [], []>} : vector<224x96xf32>, vector<96x16xf32>, vector<224x16xf32> -> vector<224x16xf32>
    %c0_7 = arith.constant 0 : index
    %c0_8 = arith.constant 0 : index
    %16 = vector.load %arg3[%c0_7, %c0_8] : memref<1x16xf32, #tpu.memory_space<vmem>>, vector<1x16xf32>
    %17 = vector.broadcast %16 : vector<1x16xf32> to vector<224x16xf32>
    %18 = arith.addf %15, %17 : vector<224x16xf32>
    %cst_9 = arith.constant 0.000000e+00 : f32
    %19 = vector.broadcast %cst_9 : f32 to vector<224x16xf32>
    %20 = arith.maximumf %18, %19 : vector<224x16xf32>
    %21 = tpu.iota {dimensions = array<i32: 0>} : vector<224x16xi32>
    %22 = tpu.iota {dimensions = array<i32: 1>} : vector<224x16xi32>
    %c15_i32 = arith.constant 15 : i32
    %23 = vector.broadcast %c15_i32 : i32 to vector<224x16xi32>
    %24 = arith.andi %21, %23 : vector<224x16xi32>
    %c8_i32 = arith.constant 8 : i32
    %25 = vector.broadcast %c8_i32 : i32 to vector<224x16xi32>
    %26 = arith.cmpi slt, %22, %25 : vector<224x16xi32>
    %c15_i32_10 = arith.constant 15 : i32
    %c14_i32 = arith.constant 14 : i32
    %27 = vector.broadcast %c15_i32_10 : i32 to vector<224x16xi32>
    %28 = vector.broadcast %c14_i32 : i32 to vector<224x16xi32>
    %29 = arith.select %26, %27, %28 : vector<224x16xi1>, vector<224x16xi32>
    %30 = arith.cmpi slt, %24, %29 : vector<224x16xi32>
    %cst_11 = arith.constant 0.000000e+00 : f32
    %31 = vector.broadcast %cst_11 : f32 to vector<224x16xf32>
    %32 = arith.select %30, %20, %31 : vector<224x16xi1>, vector<224x16xf32>
    %33 = vector.extract_strided_slice %32 {offsets = [0, 0], sizes = [16, 16], strides = [1, 1]} : vector<224x16xf32> to vector<16x16xf32>
    %cst_12 = arith.constant dense<0xFF800000> : vector<16xf32>
    %34 = vector.multi_reduction <maximumf>, %33, %cst_12 [0] : vector<16x16xf32> to vector<16xf32>
    %35 = vector.shape_cast %34 : vector<16xf32> to vector<1x16xf32>
    %36 = vector.extract_strided_slice %32 {offsets = [16, 0], sizes = [16, 16], strides = [1, 1]} : vector<224x16xf32> to vector<16x16xf32>
    %cst_13 = arith.constant dense<0xFF800000> : vector<16xf32>
    %37 = vector.multi_reduction <maximumf>, %36, %cst_13 [0] : vector<16x16xf32> to vector<16xf32>
    %38 = vector.shape_cast %37 : vector<16xf32> to vector<1x16xf32>
    %39 = vector.extract_strided_slice %32 {offsets = [32, 0], sizes = [16, 16], strides = [1, 1]} : vector<224x16xf32> to vector<16x16xf32>
    %cst_14 = arith.constant dense<0xFF800000> : vector<16xf32>
    %40 = vector.multi_reduction <maximumf>, %39, %cst_14 [0] : vector<16x16xf32> to vector<16xf32>
    %41 = vector.shape_cast %40 : vector<16xf32> to vector<1x16xf32>
    %42 = vector.extract_strided_slice %32 {offsets = [48, 0], sizes = [16, 16], strides = [1, 1]} : vector<224x16xf32> to vector<16x16xf32>
    %cst_15 = arith.constant dense<0xFF800000> : vector<16xf32>
    %43 = vector.multi_reduction <maximumf>, %42, %cst_15 [0] : vector<16x16xf32> to vector<16xf32>
    %44 = vector.shape_cast %43 : vector<16xf32> to vector<1x16xf32>
    %45 = vector.extract_strided_slice %32 {offsets = [64, 0], sizes = [16, 16], strides = [1, 1]} : vector<224x16xf32> to vector<16x16xf32>
    %cst_16 = arith.constant dense<0xFF800000> : vector<16xf32>
    %46 = vector.multi_reduction <maximumf>, %45, %cst_16 [0] : vector<16x16xf32> to vector<16xf32>
    %47 = vector.shape_cast %46 : vector<16xf32> to vector<1x16xf32>
    %48 = vector.extract_strided_slice %32 {offsets = [80, 0], sizes = [16, 16], strides = [1, 1]} : vector<224x16xf32> to vector<16x16xf32>
    %cst_17 = arith.constant dense<0xFF800000> : vector<16xf32>
    %49 = vector.multi_reduction <maximumf>, %48, %cst_17 [0] : vector<16x16xf32> to vector<16xf32>
    %50 = vector.shape_cast %49 : vector<16xf32> to vector<1x16xf32>
    %51 = vector.extract_strided_slice %32 {offsets = [96, 0], sizes = [16, 16], strides = [1, 1]} : vector<224x16xf32> to vector<16x16xf32>
    %cst_18 = arith.constant dense<0xFF800000> : vector<16xf32>
    %52 = vector.multi_reduction <maximumf>, %51, %cst_18 [0] : vector<16x16xf32> to vector<16xf32>
    %53 = vector.shape_cast %52 : vector<16xf32> to vector<1x16xf32>
    %54 = vector.extract_strided_slice %32 {offsets = [112, 0], sizes = [16, 16], strides = [1, 1]} : vector<224x16xf32> to vector<16x16xf32>
    %cst_19 = arith.constant dense<0xFF800000> : vector<16xf32>
    %55 = vector.multi_reduction <maximumf>, %54, %cst_19 [0] : vector<16x16xf32> to vector<16xf32>
    %56 = vector.shape_cast %55 : vector<16xf32> to vector<1x16xf32>
    %57 = vector.extract_strided_slice %32 {offsets = [128, 0], sizes = [16, 16], strides = [1, 1]} : vector<224x16xf32> to vector<16x16xf32>
    %cst_20 = arith.constant dense<0xFF800000> : vector<16xf32>
    %58 = vector.multi_reduction <maximumf>, %57, %cst_20 [0] : vector<16x16xf32> to vector<16xf32>
    %59 = vector.shape_cast %58 : vector<16xf32> to vector<1x16xf32>
    %60 = vector.extract_strided_slice %32 {offsets = [144, 0], sizes = [16, 16], strides = [1, 1]} : vector<224x16xf32> to vector<16x16xf32>
    %cst_21 = arith.constant dense<0xFF800000> : vector<16xf32>
    %61 = vector.multi_reduction <maximumf>, %60, %cst_21 [0] : vector<16x16xf32> to vector<16xf32>
    %62 = vector.shape_cast %61 : vector<16xf32> to vector<1x16xf32>
    %63 = vector.extract_strided_slice %32 {offsets = [160, 0], sizes = [16, 16], strides = [1, 1]} : vector<224x16xf32> to vector<16x16xf32>
    %cst_22 = arith.constant dense<0xFF800000> : vector<16xf32>
    %64 = vector.multi_reduction <maximumf>, %63, %cst_22 [0] : vector<16x16xf32> to vector<16xf32>
    %65 = vector.shape_cast %64 : vector<16xf32> to vector<1x16xf32>
    %66 = vector.extract_strided_slice %32 {offsets = [176, 0], sizes = [16, 16], strides = [1, 1]} : vector<224x16xf32> to vector<16x16xf32>
    %cst_23 = arith.constant dense<0xFF800000> : vector<16xf32>
    %67 = vector.multi_reduction <maximumf>, %66, %cst_23 [0] : vector<16x16xf32> to vector<16xf32>
    %68 = vector.shape_cast %67 : vector<16xf32> to vector<1x16xf32>
    %69 = vector.extract_strided_slice %32 {offsets = [192, 0], sizes = [16, 16], strides = [1, 1]} : vector<224x16xf32> to vector<16x16xf32>
    %cst_24 = arith.constant dense<0xFF800000> : vector<16xf32>
    %70 = vector.multi_reduction <maximumf>, %69, %cst_24 [0] : vector<16x16xf32> to vector<16xf32>
    %71 = vector.shape_cast %70 : vector<16xf32> to vector<1x16xf32>
    %72 = vector.extract_strided_slice %32 {offsets = [208, 0], sizes = [16, 16], strides = [1, 1]} : vector<224x16xf32> to vector<16x16xf32>
    %cst_25 = arith.constant dense<0xFF800000> : vector<16xf32>
    %73 = vector.multi_reduction <maximumf>, %72, %cst_25 [0] : vector<16x16xf32> to vector<16xf32>
    %74 = vector.shape_cast %73 : vector<16xf32> to vector<1x16xf32>
    %75 = tpu.concatenate %35, %38, %41, %44, %47, %50, %53, %56, %59, %62, %65, %68, %71, %74 in 0 : vector<1x16xf32>, vector<1x16xf32>, vector<1x16xf32>, vector<1x16xf32>, vector<1x16xf32>, vector<1x16xf32>, vector<1x16xf32>, vector<1x16xf32>, vector<1x16xf32>, vector<1x16xf32>, vector<1x16xf32>, vector<1x16xf32>, vector<1x16xf32>, vector<1x16xf32> -> vector<14x16xf32>
    %cst_26 = arith.constant 0.000000e+00 : f32
    %76 = vector.broadcast %cst_26 : f32 to vector<4x16xf32>
    %77 = tpu.concatenate %75, %76 in 0 : vector<14x16xf32>, vector<4x16xf32> -> vector<18x16xf32>
    %78 = vector.extract_strided_slice %77 {offsets = [0, 0], sizes = [14, 16], strides = [1, 1]} : vector<18x16xf32> to vector<14x16xf32>
    %79 = vector.extract_strided_slice %77 {offsets = [2, 0], sizes = [14, 16], strides = [1, 1]} : vector<18x16xf32> to vector<14x16xf32>
    %80 = vector.extract_strided_slice %77 {offsets = [4, 0], sizes = [14, 16], strides = [1, 1]} : vector<18x16xf32> to vector<14x16xf32>
    %81 = tpu.concatenate %78, %79, %80 in 1 : vector<14x16xf32>, vector<14x16xf32>, vector<14x16xf32> -> vector<14x48xf32>
    %c0_27 = arith.constant 0 : index
    %c0_28 = arith.constant 0 : index
    %82 = vector.load %arg4[%c0_27, %c0_28] : memref<48x16xf32, #tpu.memory_space<vmem>>, vector<48x16xf32>
    %cst_29 = arith.constant dense<0.000000e+00> : vector<14x16xf32>
    %83 = tpu.matmul %81, %82, %cst_29 {dimension_numbers = #tpu.dot_dimension_numbers<[1], [0], [0], [1], [0, 0, 1, 1], [], []>} : vector<14x48xf32>, vector<48x16xf32>, vector<14x16xf32> -> vector<14x16xf32>
    %c0_30 = arith.constant 0 : index
    %c0_31 = arith.constant 0 : index
    %84 = vector.load %arg5[%c0_30, %c0_31] : memref<1x16xf32, #tpu.memory_space<vmem>>, vector<1x16xf32>
    %85 = vector.broadcast %84 : vector<1x16xf32> to vector<14x16xf32>
    %86 = arith.addf %83, %85 : vector<14x16xf32>
    %cst_32 = arith.constant 0.000000e+00 : f32
    %87 = vector.broadcast %cst_32 : f32 to vector<14x16xf32>
    %88 = arith.maximumf %86, %87 : vector<14x16xf32>
    %89 = tpu.iota {dimensions = array<i32: 0>} : vector<14x16xi32>
    %90 = tpu.iota {dimensions = array<i32: 1>} : vector<14x16xi32>
    %c8_i32_33 = arith.constant 8 : i32
    %91 = vector.broadcast %c8_i32_33 : i32 to vector<14x16xi32>
    %92 = arith.cmpi slt, %90, %91 : vector<14x16xi32>
    %c12_i32 = arith.constant 12 : i32
    %c10_i32 = arith.constant 10 : i32
    %93 = vector.broadcast %c12_i32 : i32 to vector<14x16xi32>
    %94 = vector.broadcast %c10_i32 : i32 to vector<14x16xi32>
    %95 = arith.select %92, %93, %94 : vector<14x16xi1>, vector<14x16xi32>
    %96 = arith.cmpi slt, %89, %95 : vector<14x16xi32>
    %cst_34 = arith.constant 0.000000e+00 : f32
    %97 = vector.broadcast %cst_34 : f32 to vector<14x16xf32>
    %98 = arith.select %96, %88, %97 : vector<14x16xi1>, vector<14x16xf32>
    %99 = vector.extract_strided_slice %98 {offsets = [0, 0], sizes = [2, 16], strides = [1, 1]} : vector<14x16xf32> to vector<2x16xf32>
    %100 = vector.extract_strided_slice %98 {offsets = [2, 0], sizes = [2, 16], strides = [1, 1]} : vector<14x16xf32> to vector<2x16xf32>
    %101 = arith.maximumf %99, %100 : vector<2x16xf32>
    %102 = vector.extract_strided_slice %98 {offsets = [4, 0], sizes = [2, 16], strides = [1, 1]} : vector<14x16xf32> to vector<2x16xf32>
    %103 = arith.maximumf %101, %102 : vector<2x16xf32>
    %104 = vector.extract_strided_slice %98 {offsets = [6, 0], sizes = [2, 16], strides = [1, 1]} : vector<14x16xf32> to vector<2x16xf32>
    %105 = arith.maximumf %103, %104 : vector<2x16xf32>
    %106 = vector.extract_strided_slice %98 {offsets = [8, 0], sizes = [2, 16], strides = [1, 1]} : vector<14x16xf32> to vector<2x16xf32>
    %107 = arith.maximumf %105, %106 : vector<2x16xf32>
    %108 = vector.extract_strided_slice %98 {offsets = [10, 0], sizes = [2, 16], strides = [1, 1]} : vector<14x16xf32> to vector<2x16xf32>
    %109 = arith.maximumf %107, %108 : vector<2x16xf32>
    %110 = vector.extract_strided_slice %98 {offsets = [12, 0], sizes = [2, 16], strides = [1, 1]} : vector<14x16xf32> to vector<2x16xf32>
    %111 = arith.maximumf %109, %110 : vector<2x16xf32>
    %c0_35 = arith.constant 0 : index
    %c0_36 = arith.constant 0 : index
    %112 = vector.load %arg6[%c0_35, %c0_36] : memref<16x4xf32, #tpu.memory_space<vmem>>, vector<16x4xf32>
    %cst_37 = arith.constant dense<0.000000e+00> : vector<2x4xf32>
    %113 = tpu.matmul %111, %112, %cst_37 {dimension_numbers = #tpu.dot_dimension_numbers<[1], [0], [0], [1], [0, 0, 1, 1], [], []>} : vector<2x16xf32>, vector<16x4xf32>, vector<2x4xf32> -> vector<2x4xf32>
    %c0_38 = arith.constant 0 : index
    %c0_39 = arith.constant 0 : index
    %114 = vector.load %arg7[%c0_38, %c0_39] : memref<1x4xf32, #tpu.memory_space<vmem>>, vector<1x4xf32>
    %115 = vector.broadcast %114 : vector<1x4xf32> to vector<2x4xf32>
    %116 = arith.addf %113, %115 : vector<2x4xf32>
    %c0_40 = arith.constant 0 : index
    %c0_41 = arith.constant 0 : index
    %117 = vector.load %arg8[%c0_40, %c0_41] : memref<2x4xf32, #tpu.memory_space<vmem>>, vector<2x4xf32>
    tpu.vector_store %arg8[%c0_40, %c0_41], %116 {strides = array<i32>} : memref<2x4xf32, #tpu.memory_space<vmem>>, vector<2x4xf32>,
    return
  }
}

</mosaic_0001>

<bundles_post_ra>
// kernel: tpu_custom_call.1
= control target key start
LH: loop header
LB: loop body
LE: loop exit
PB: predicated region body
PF: predicated region fallthrough
CT: control target
= control target key end

     0   :  { %v1570_v3 = vmov 0   ;;  %s2413_s0 = inlined_call_operand.vmem [shape: s32[224,1], index: 0, kind: input, shape index: {}]   ;;  %s2414_s1 = inlined_call_operand.vmem [shape: f32[50,32], index: 1, kind: input, shape index: {}]   ;;  %s2415_s2 = inlined_call_operand.vmem [shape: f32[96,16], index: 2, kind: input, shape index: {}]   ;;  %s2416_s3 = inlined_call_operand.vmem [shape: f32[1,16], index: 3, kind: input, shape index: {}]   ;;  %s2417_s4 = inlined_call_operand.vmem [shape: f32[48,16], index: 4, kind: input, shape index: {}]   ;;  %s2418_s5 = inlined_call_operand.vmem [shape: f32[1,16], index: 5, kind: input, shape index: {}]   ;;  %s2419_s6 = inlined_call_operand.vmem [shape: f32[16,4], index: 6, kind: input, shape index: {}]   ;;  %s2420_s7 = inlined_call_operand.vmem [shape: f32[1,4], index: 7, kind: input, shape index: {}]   ;;  %s2421_s8 = inlined_call_operand.hbm [shape: f32[2,4], index: 8, kind: output, shape index: {}]  }
   0x1   :  { %v34_v0 = vld [vmem:[%s2413_s0 + $0x20] sm:$0xff]  ;;  %v32_v1 = vld [vmem:[%s2413_s0 + $0x10] sm:$0xff]  ;;  %1540 = vset.pattern.permute.xlu2 %v1570_v3  ;;  %1539 = vset.pattern.permute.xlu1 %v1570_v3 }
   0x2   :  { %v30_v2 = vld [vmem:[%s2413_s0] sm:$0xff]  ;;  %1538 = vset.pattern.permute.xlu0 %v1570_v3  ;;  %73 = vperm.xlu2 %1540, %v34_v0  }
   0x3   :  { %67 = vperm.xlu1 %1539, %v32_v1   ;;  %61 = vperm.xlu0 %1538, %v30_v2  }
   0x4   :  { %13 = vsyncpa [#allocation3], 0  ;;  %v35_v4 = vld [vmem:[%s2413_s0 + $0x28] sm:$0xff]  ;;  %v33_v5 = vld [vmem:[%s2413_s0 + $0x18] sm:$0xff]  ;;  %vm320_vm0 = vcmask 1041408   ;;  %v58_v36 = vlaneseq  ;;  %vm235_vm1 = vcmask 408576  }
   0x5   :  { %v31_v6 = vld [vmem:[%s2413_s0 + $0x8] sm:$0xff]  ;;  %v38_v7 = vld [vmem:[%s2413_s0 + $0x40] sm:$0xff]  ;;  %v37_v8 = vld [vmem:[%s2413_s0 + $0x38] sm:$0xff]  ;;  %v1571_v41 = vmov 0.0   ;;  %s1573_s30 = smov 32   ;;  %s1575_s20 = smov 16  }
   0x6   :  { %v36_v9 = vld [vmem:[%s2413_s0 + $0x30] sm:$0xff]  ;;  %v41_v10 = vld [vmem:[%s2413_s0 + $0x58] sm:$0xff]  ;;  %v39_v12 = vld [vmem:[%s2413_s0 + $0x48] sm:$0xff]  ;;  %v1731_v38 = vand.u32 127, %v58_v36  ;;  %s1414_s9 = sshll.u32 %s2421_s8, 4  ;;  %s1415_s9 = int_to_ptr.hbm [resolvable:$true] %s1414_s9 }
   0x7   :  { %v40_v11 = vld [vmem:[%s2413_s0 + $0x50] sm:$0xff]  ;;  %v43_v14 = vld [vmem:[%s2413_s0 + $0x68] sm:$0xff]  ;;  %v42_v15 = vld [vmem:[%s2413_s0 + $0x60] sm:$0xff] }
   0x8   :  { %v44_v13 = vld [vmem:[%s2413_s0 + $0x70] sm:$0xff]  ;;  %v47_v16 = vld [vmem:[%s2413_s0 + $0x88] sm:$0xff]  ;;  %v46_v17 = vld [vmem:[%s2413_s0 + $0x80] sm:$0xff] }
   0x9   :  { %v45_v18 = vld [vmem:[%s2413_s0 + $0x78] sm:$0xff]  ;;  %v50_v19 = vld [vmem:[%s2413_s0 + $0xa0] sm:$0xff]  ;;  %v48_v21 = vld [vmem:[%s2413_s0 + $0x90] sm:$0xff] }
   0xa   :  { %76 = vperm.xlu2 %1540, %v35_v4   ;;  %v49_v20 = vld [vmem:[%s2413_s0 + $0x98] sm:$0xff]  ;;  %v52_v23 = vld [vmem:[%s2413_s0 + $0xb0] sm:$0xff]  ;;  %v51_v24 = vld [vmem:[%s2413_s0 + $0xa8] sm:$0xff] }
   0xb   :  { %70 = vperm.xlu1 %1539, %v33_v5   ;;  %64 = vperm.xlu0 %1538, %v31_v6   ;;  %v53_v22 = vld [vmem:[%s2413_s0 + $0xb8] sm:$0xff]  ;;  %v56_v25 = vld [vmem:[%s2413_s0 + $0xd0] sm:$0xff]  ;;  %v55_v26 = vld [vmem:[%s2413_s0 + $0xc8] sm:$0xff] }
   0xc   :  { %v54_v27 = vld [vmem:[%s2413_s0 + $0xc0] sm:$0xff]  ;;  %v234_v28 = vld [vmem:[%s2414_s1 + $0x30] sm:$0x3]  ;;  %v233_v29 = vld [vmem:[%s2414_s1 + $0x28] sm:$0xff] }
   0xd   :  { %1451 = vmatpush.msk.msra.mxu0 %vm320_vm0, %v234_v28  ;;  %1511 = vmatpush.msk.msra.mxu2 %vm320_vm0, %v234_v28  ;;  %v57_v30 = vld [vmem:[%s2413_s0 + $0xd8] sm:$0xff]  ;;  %v232_v31 = vld [vmem:[%s2414_s1 + $0x20] sm:$0xff]  ;;  %v230_v33 = vld [vmem:[%s2414_s1 + $0x10] sm:$0xff]  ;;  %s1577_s0 = smov [#allocation2]  }
   0xe   :  { %v231_v32 = vld [vmem:[%s2414_s1 + $0x18] sm:$0xff]  ;;  %v229_v34 = vld [vmem:[%s2414_s1 + $0x8] sm:$0xff]  ;;  %v228_v35 = vld [vmem:[%s2414_s1] sm:$0xff]  ;;  %s1572_s1 = smov 64   ;;  %s1412_s27 = sshll.u32 %s1577_s0, 4  ;;  %s1413_s27 = int_to_ptr.vmem [resolvable:$true] %s1412_s27 }
   0xf   :  { %334 = vmatpush.msra.mxu0 %v233_v29  ;;  %1512 = vmatpush.msra.mxu2 %v233_v29 }
  0x11   :  { %335 = vmatpush.msra.mxu0 %v232_v31  ;;  %1513 = vmatpush.msra.mxu2 %v232_v31 }
  0x12   :  { %85 = vperm.xlu2 %1540, %v38_v7  }
  0x13   :  { %82 = vperm.xlu1 %1539, %v37_v8   ;;  %79 = vperm.xlu0 %1538, %v36_v9  }
  0x14   :  { %336 = vmatpush.msra.mxu0 %v231_v32  ;;  %1514 = vmatpush.msra.mxu2 %v231_v32 }
  0x16   :  { %337 = vmatpush.msra.mxu0 %v230_v33  ;;  %1515 = vmatpush.msra.mxu2 %v230_v33 }
  0x18   :  { %338 = vmatpush.msra.mxu0 %v229_v34  ;;  %1516 = vmatpush.msra.mxu2 %v229_v34 }
  0x1a   :  { %94 = vperm.xlu2 %1540, %v41_v10   ;;  %339 = vmatpush.msra.mxu0 %v228_v35 }
  0x1b   :  { %91 = vperm.xlu1 %1539, %v40_v11   ;;  %88 = vperm.xlu0 %1538, %v39_v12  }
  0x1c   :  { %1517 = vmatpush.msra.mxu2 %v228_v35 }
  0x22   :  { %103 = vperm.xlu2 %1540, %v44_v13  }
  0x23   :  { %100 = vperm.xlu1 %1539, %v43_v14   ;;  %97 = vperm.xlu0 %1538, %v42_v15  }
  0x2a   :  { %112 = vperm.xlu2 %1540, %v47_v16  }
  0x2b   :  { %109 = vperm.xlu1 %1539, %v46_v17   ;;  %106 = vperm.xlu0 %1538, %v45_v18  }
  0x32   :  { %121 = vperm.xlu2 %1540, %v50_v19  }
  0x33   :  { %118 = vperm.xlu1 %1539, %v49_v20   ;;  %115 = vperm.xlu0 %1538, %v48_v21  }
  0x3a   :  { %130 = vperm.xlu2 %1540, %v53_v22  }
  0x3b   :  { %127 = vperm.xlu1 %1539, %v52_v23   ;;  %124 = vperm.xlu0 %1538, %v51_v24  }
  0x42   :  { %139 = vperm.xlu2 %1540, %v56_v25  }
  0x43   :  { %136 = vperm.xlu1 %1539, %v55_v26   ;;  %133 = vperm.xlu0 %1538, %v54_v27  }
  0x4b   :  { %142 = vperm.xlu0 %1538, %v57_v30  }
  0x5c   :  { %v74_v37 = vpop.permute.xlu2 %73 }
  0x5d   :  { %vm148_vm6 = vcmp.eq.s32.totalorder %v74_v37, %v1731_v38 }
  0x5e   :  { %v1427_v55 = vsel %vm148_vm6, 1.0, %v1571_v41 }
  0x64   :  { %v77_v43 = vpop.permute.xlu2 %76 }
  0x65   :  { %vm149_vm7 = vcmp.eq.s32.totalorder %v77_v43, %v1731_v38 }
  0x66   :  { %v1428_v60 = vsel %vm149_vm7, 1.0, %v1571_v41 }
  0x6c   :  { %v86_v47 = vpop.permute.xlu2 %85 }
  0x6d   :  { %vm152_vm13 = vcmp.eq.s32.totalorder %v86_v47, %v1731_v38 }
  0x6e   :  { %v1431_v6 = vsel %vm152_vm13, 1.0, %v1571_v41 }
  0x74   :  { %v95_v53 = vpop.permute.xlu2 %94 }
  0x75   :  { %v68_v39 = vpop.permute.xlu1 %67  ;;  %v62_v40 = vpop.permute.xlu0 %61 }
  0x76   :  { %vm144_vm2 = vcmp.eq.s32.totalorder %v62_v40, %v1731_v38  ;;  %vm146_vm4 = vcmp.eq.s32.totalorder %v68_v39, %v1731_v38 }
  0x77   :  { %v1423_v42 = vsel %vm144_vm2, 1.0, %v1571_v41  ;;  %v1425_v48 = vsel %vm146_vm4, 1.0, %v1571_v41 }
  0x78   :  { %1452 = vmatmul.msk.f32.vlgmr.msra.gmra.mxu0 %vm235_vm1, %v1423_v42 }
  0x7c   :  { %v1750_v58 = vpop.permute.xlu2 %103 }
  0x7d   :  { %v71_v44 = vpop.permute.xlu1 %70  ;;  %v65_v45 = vpop.permute.xlu0 %64 }
  0x7e   :  { %vm145_vm3 = vcmp.eq.s32.totalorder %v65_v45, %v1731_v38  ;;  %vm147_vm5 = vcmp.eq.s32.totalorder %v71_v44, %v1731_v38 }
  0x7f   :  { %v1424_v46 = vsel %vm145_vm3, 1.0, %v1571_v41  ;;  %v1426_v54 = vsel %vm147_vm5, 1.0, %v1571_v41  ;;  %vm155_vm5 = vcmp.eq.s32.totalorder %v95_v53, %v1731_v38 }
  0x80   :  { %1453 = vmatmul.msk.f32.gmra.mxu0 %vm235_vm1, %v1424_v46  ;;  %v1434_v15 = vsel %vm155_vm5, 1.0, %v1571_v41  ;;  %vm812_vm5 = vcmask 785408  }
  0x84   :  { %v113_v63 = vpop.permute.xlu2 %112 }
  0x85   :  { %v83_v49 = vpop.permute.xlu1 %82  ;;  %v80_v50 = vpop.permute.xlu0 %79  ;;  %vm161_vm9 = vcmp.eq.s32.totalorder %v113_v63, %v1731_v38 }
  0x86   :  { %vm150_vm10 = vcmp.eq.s32.totalorder %v80_v50, %v1731_v38  ;;  %v1440_v0 = vsel %vm161_vm9, 1.0, %v1571_v41  ;;  %vm151_vm11 = vcmp.eq.s32.totalorder %v83_v49, %v1731_v38 }
  0x87   :  { %v1429_v1 = vsel %vm150_vm10, 1.0, %v1571_v41  ;;  %v1430_v3 = vsel %vm151_vm11, 1.0, %v1571_v41  ;;  %vm158_vm11 = vcmp.eq.s32.totalorder %v1750_v58, %v1731_v38 }
  0x88   :  { %1454 = vmatmul.msk.f32.gmra.mxu0 %vm235_vm1, %v1425_v48  ;;  %v1437_v24 = vsel %vm158_vm11, 1.0, %v1571_v41  ;;  %vm1268_vm11 = vcmask 1040384  }
  0x8c   :  { %v122_v8 = vpop.permute.xlu2 %121 }
  0x8d   :  { %v92_v51 = vpop.permute.xlu1 %91  ;;  %v89_v52 = vpop.permute.xlu0 %88  ;;  %vm164_vm15 = vcmp.eq.s32.totalorder %v122_v8, %v1731_v38  ;;  %v807_v8 = vld [vmem:[%s2415_s2 + $0x58] sm:$0xff] }
  0x8e   :  { %vm153_vm2 = vcmp.eq.s32.totalorder %v89_v52, %v1731_v38  ;;  %v1443_v9 = vsel %vm164_vm15, 1.0, %v1571_v41  ;;  %vm154_vm3 = vcmp.eq.s32.totalorder %v92_v51, %v1731_v38  ;;  %901 = vmatpush.msra.mxu1 %v807_v8  ;;  %1518 = vmatpush.msra.mxu3 %v807_v8 }
  0x8f   :  { %v1432_v10 = vsel %vm153_vm2, 1.0, %v1571_v41  ;;  %v1433_v12 = vsel %vm154_vm3, 1.0, %v1571_v41  ;;  %vm596_vm2 = vcmask 1045504   ;;  %vm454_vm3 = vcmask 1046528  }
  0x90   :  { %1455 = vmatmul.msk.f32.gmra.mxu0 %vm235_vm1, %v1426_v54 }
  0x94   :  { %v131_v17 = vpop.permute.xlu2 %130 }
  0x95   :  { %v1747_v56 = vpop.permute.xlu1 %100  ;;  %v98_v57 = vpop.permute.xlu0 %97  ;;  %vm167_vm7 = vcmp.eq.s32.totalorder %v131_v17, %v1731_v38 }
  0x96   :  { %v1446_v18 = vsel %vm167_vm7, 1.0, %v1571_v41  ;;  %vm157_vm9 = vcmp.eq.s32.totalorder %v1747_v56, %v1731_v38 }
  0x97   :  { %v1436_v21 = vsel %vm157_vm9, 1.0, %v1571_v41 }
  0x98   :  { %1456 = vmatmul.msk.f32.gmra.mxu0 %vm235_vm1, %v1427_v55 }
  0x9c   :  { %v140_v26 = vpop.permute.xlu2 %139 }
  0x9d   :  { %v110_v59 = vpop.permute.xlu1 %109  ;;  %v1756_v62 = vpop.permute.xlu0 %106  ;;  %vm170_vm13 = vcmp.eq.s32.totalorder %v140_v26, %v1731_v38  ;;  %v797_v26 = vld [vmem:[%s2415_s2 + $0x8] sm:$0xff] }
  0x9e   :  { %vm160_vm8 = vcmp.eq.s32.totalorder %v110_v59, %v1731_v38  ;;  %v1449_v27 = vsel %vm170_vm13, 1.0, %v1571_v41 }
  0x9f   :  { %v1439_v61 = vsel %vm160_vm8, 1.0, %v1571_v41  ;;  %vm156_vm8 = vcmp.eq.s32.totalorder %v98_v57, %v1731_v38 }
  0xa0   :  { %1457 = vmatmul.msk.f32.gmra.mxu0 %vm235_vm1, %v1428_v60  ;;  %1468 = vmatmul.msk.f32.vlgmr.msra.gmra.mxu2 %vm235_vm1, %v1439_v61  ;;  %v1435_v19 = vsel %vm156_vm8, 1.0, %v1571_v41  ;;  %vm1141_vm8 = vcmask 130048  }
  0xa5   :  { %v116_v2 = vpop.permute.xlu0 %115  ;;  %v119_v5 = vpop.permute.xlu1 %118 }
  0xa6   :  { %vm162_vm12 = vcmp.eq.s32.totalorder %v116_v2, %v1731_v38  ;;  %vm163_vm14 = vcmp.eq.s32.totalorder %v119_v5, %v1731_v38 }
  0xa7   :  { %v1441_v4 = vsel %vm162_vm12, 1.0, %v1571_v41  ;;  %v1442_v7 = vsel %vm163_vm14, 1.0, %v1571_v41  ;;  %vm159_vm14 = vcmp.eq.s32.totalorder %v1756_v62, %v1731_v38 }
  0xa8   :  { %1458 = vmatmul.msk.f32.gmra.mxu0 %vm235_vm1, %v1429_v1  ;;  %1469 = vmatmul.msk.f32.gmra.mxu2 %vm235_vm1, %v1440_v0  ;;  %v1438_v28 = vsel %vm159_vm14, 1.0, %v1571_v41 }
  0xad   :  { %v125_v11 = vpop.permute.xlu0 %124  ;;  %v128_v14 = vpop.permute.xlu1 %127 }
  0xae   :  { %vm165_vm4 = vcmp.eq.s32.totalorder %v125_v11, %v1731_v38  ;;  %vm166_vm6 = vcmp.eq.s32.totalorder %v128_v14, %v1731_v38  ;;  %v806_v11 = vld [vmem:[%s2415_s2 + $0x50] sm:$0xff] }
  0xaf   :  { %v1444_v13 = vsel %vm165_vm4, 1.0, %v1571_v41  ;;  %v1445_v16 = vsel %vm166_vm6, 1.0, %v1571_v41  ;;  %902 = vmatpush.msra.mxu1 %v806_v11  ;;  %1519 = vmatpush.msra.mxu3 %v806_v11  ;;  %vm767_vm4 = vcmask 523264   ;;  %vm1083_vm6 = vcmp.lt.s32.totalorder %v1731_v38, 8 }
  0xb0   :  { %1459 = vmatmul.msk.f32.gmra.mxu0 %vm235_vm1, %v1430_v3  ;;  %1470 = vmatmul.msk.f32.gmra.mxu2 %vm235_vm1, %v1441_v4 }
  0xb5   :  { %v134_v20 = vpop.permute.xlu0 %133  ;;  %v137_v23 = vpop.permute.xlu1 %136 }
  0xb6   :  { %vm168_vm10 = vcmp.eq.s32.totalorder %v134_v20, %v1731_v38  ;;  %vm169_vm12 = vcmp.eq.s32.totalorder %v137_v23, %v1731_v38  ;;  %v802_v20 = vld [vmem:[%s2415_s2 + $0x30] sm:$0xff]  ;;  %v800_v23 = vld [vmem:[%s2415_s2 + $0x20] sm:$0xff] }
  0xb7   :  { %v1447_v22 = vsel %vm168_vm10, 1.0, %v1571_v41  ;;  %v1448_v25 = vsel %vm169_vm12, 1.0, %v1571_v41 }
  0xb8   :  { %1460 = vmatmul.msk.f32.gmra.mxu0 %vm235_vm1, %v1431_v6  ;;  %1471 = vmatmul.msk.f32.gmra.mxu2 %vm235_vm1, %v1442_v7 }
  0xbd   :  { %v143_v29 = vpop.permute.xlu0 %142 }
  0xbe   :  { %vm171_vm15 = vcmp.eq.s32.totalorder %v143_v29, %v1731_v38  ;;  %v1543_v38 = vld [vmem:[%s2420_s7] ss:$0 sm:$0xff] }
  0xbf   :  { %v1450_v31 = vsel %vm171_vm15, 1.0, %v1571_v41 }
  0xc0   :  { %1461 = vmatmul.msk.f32.gmra.mxu0 %vm235_vm1, %v1432_v10  ;;  %1472 = vmatmul.msk.f32.gmra.mxu2 %vm235_vm1, %v1443_v9 }
  0xc8   :  { %1462 = vmatmul.msk.f32.gmra.mxu0 %vm235_vm1, %v1433_v12  ;;  %1473 = vmatmul.msk.f32.gmra.mxu2 %vm235_vm1, %v1444_v13  ;;  %v805_v12 = vld [vmem:[%s2415_s2 + $0x48] sm:$0xff] }
  0xc9   :  { %903 = vmatpush.msra.mxu1 %v805_v12  ;;  %1520 = vmatpush.msra.mxu3 %v805_v12 }
  0xd0   :  { %1463 = vmatmul.msk.f32.gmra.mxu0 %vm235_vm1, %v1434_v15  ;;  %1474 = vmatmul.msk.f32.gmra.mxu2 %vm235_vm1, %v1445_v16  ;;  %v804_v16 = vld [vmem:[%s2415_s2 + $0x40] sm:$0xff] }
  0xd1   :  { %904 = vmatpush.msra.mxu1 %v804_v16  ;;  %1521 = vmatpush.msra.mxu3 %v804_v16 }
  0xd8   :  { %1464 = vmatmul.msk.f32.gmra.mxu0 %vm235_vm1, %v1435_v19  ;;  %1475 = vmatmul.msk.f32.gmra.mxu2 %vm235_vm1, %v1446_v18  ;;  %v803_v18 = vld [vmem:[%s2415_s2 + $0x38] sm:$0xff] }
  0xd9   :  { %905 = vmatpush.msra.mxu1 %v803_v18  ;;  %1522 = vmatpush.msra.mxu3 %v803_v18 }
  0xdb   :  { %906 = vmatpush.msra.mxu1 %v802_v20  ;;  %1523 = vmatpush.msra.mxu3 %v802_v20 }
  0xe0   :  { %1465 = vmatmul.msk.f32.gmra.mxu0 %vm235_vm1, %v1436_v21  ;;  %1476 = vmatmul.msk.f32.gmra.mxu2 %vm235_vm1, %v1447_v22  ;;  %v801_v21 = vld [vmem:[%s2415_s2 + $0x28] sm:$0xff] }
  0xe1   :  { %907 = vmatpush.msra.mxu1 %v801_v21  ;;  %1524 = vmatpush.msra.mxu3 %v801_v21 }
  0xe3   :  { %908 = vmatpush.msra.mxu1 %v800_v23  ;;  %1525 = vmatpush.msra.mxu3 %v800_v23 }
  0xe8   :  { %1466 = vmatmul.msk.f32.gmra.mxu0 %vm235_vm1, %v1437_v24  ;;  %1477 = vmatmul.msk.f32.gmra.mxu2 %vm235_vm1, %v1448_v25  ;;  %v799_v24 = vld [vmem:[%s2415_s2 + $0x18] sm:$0xff]  ;;  %v798_v25 = vld [vmem:[%s2415_s2 + $0x10] sm:$0xff] }
  0xe9   :  { %909 = vmatpush.msra.mxu1 %v799_v24  ;;  %1526 = vmatpush.msra.mxu3 %v799_v24 }
  0xeb   :  { %910 = vmatpush.msra.mxu1 %v798_v25  ;;  %1527 = vmatpush.msra.mxu3 %v798_v25 }
  0xed   :  { %911 = vmatpush.msra.mxu1 %v797_v26  ;;  %1528 = vmatpush.msra.mxu3 %v797_v26 }
  0xf0   :  { %1467 = vmatmul.msk.f32.gmra.mxu0 %vm235_vm1, %v1438_v28  ;;  %1478 = vmatmul.msk.f32.gmra.mxu2 %vm235_vm1, %v1449_v27  ;;  %v796_v28 = vld [vmem:[%s2415_s2] sm:$0xff] }
  0xf1   :  { %912 = vmatpush.msra.mxu1 %v796_v28  ;;  %1529 = vmatpush.msra.mxu3 %v796_v28 }
  0xf5   :  { %v1824_v30 = vpop.f32.mrf.mxu0 }
  0xf6   :  { %v455_v33 = vrot.slane %v1824_v30, 1  ;;  %v597_v34 = vrot.slane %v1824_v30, 2 }
  0xf8   :  { %1479 = vmatmul.msk.f32.gmra.mxu2 %vm235_vm1, %v1450_v31  ;;  %vm738_vm1 = vcmask 261120  }
  0xfd   :  { %v1828_v32 = vpop.f32.mrf.mxu0 }
  0xfe   :  { %v456_v35 = vrot.slane %v1828_v32, 1  ;;  %v598_v37 = vrot.slane %v1828_v32, 2 }
 0x100   :  { %v599_v39 = vsel %vm596_vm2, %v597_v34, %v598_v37  ;;  %v457_v40 = vsel %vm454_vm3, %v455_v33, %v456_v35 }
 0x101   :  { %654 = vrot.lane.b32.xlu1 %v599_v39, %s1572_s1  ;;  %512 = vrot.lane.b32.xlu0 %v457_v40, %s1573_s30 }
 0x105   :  { %v1838_v42 = vpop.f32.mrf.mxu0 }
 0x106   :  { %v600_v43 = vrot.slane %v1838_v42, 2  ;;  %v458_v58 = vrot.slane %v1838_v42, 1 }
 0x108   :  { %v601_v44 = vsel %vm596_vm2, %v598_v37, %v600_v43  ;;  %v459_v63 = vsel %vm454_vm3, %v456_v35, %v458_v58 }
 0x109   :  { %656 = vrot.lane.b32.xlu2 %v601_v44, %s1572_s1 }
 0x10d   :  { %v1843_v45 = vpop.f32.mrf.mxu0 }
 0x10e   :  { %v602_v59 = vrot.slane %v1843_v45, 2  ;;  %v460_v4 = vrot.slane %v1843_v45, 1 }
 0x110   :  { %v603_v0 = vsel %vm596_vm2, %v600_v43, %v602_v59  ;;  %v461_v10 = vsel %vm454_vm3, %v458_v58, %v460_v4 }
 0x115   :  { %v1845_v46 = vpop.f32.mrf.mxu0 }
 0x116   :  { %v462_v2 = vrot.slane %v1845_v46, 1 }
 0x118   :  { %v463_v6 = vsel %vm454_vm3, %v460_v4, %v462_v2 }
 0x11d   :  { %v1847_v47 = vpop.f32.mrf.mxu0 }
 0x123   :  { %v1849_v48 = vpop.f32.mrf.mxu2 }
 0x124   :  { %v486_v51 = vrot.slane %v1849_v48, 1  ;;  %v628_v52 = vrot.slane %v1849_v48, 2 }
 0x125   :  { %v1851_v49 = vpop.f32.mrf.mxu0 }
 0x126   :  { %v466_v11 = vrot.slane %v1851_v49, 1 }
 0x12b   :  { %v1853_v50 = vpop.f32.mrf.mxu2 }
 0x12c   :  { %v488_v53 = vrot.slane %v1853_v50, 1  ;;  %v630_v54 = vrot.slane %v1853_v50, 2 }
 0x12d   :  { %v1859_v55 = vpop.f32.mrf.mxu0 }
 0x12e   :  { %v631_v56 = vsel %vm596_vm2, %v628_v52, %v630_v54  ;;  %v489_v57 = vsel %vm454_vm3, %v486_v51, %v488_v53  ;;  %v468_v8 = vrot.slane %v1859_v55, 1  ;;  %v610_v24 = vrot.slane %v1859_v55, 2 }
 0x12f   :  { %686 = vrot.lane.b32.xlu1 %v631_v56, %s1572_s1  ;;  %544 = vrot.lane.b32.xlu0 %v489_v57, %s1573_s30  ;;  %v604_v56 = vrot.slane %v1845_v46, 2 }
 0x133   :  { %v1871_v60 = vpop.f32.mrf.mxu2 }
 0x134   :  { %v632_v61 = vrot.slane %v1871_v60, 2  ;;  %v490_v3 = vrot.slane %v1871_v60, 1 }
 0x135   :  { %v1874_v62 = vpop.f32.mrf.mxu0 }
 0x136   :  { %v633_v1 = vsel %vm596_vm2, %v630_v54, %v632_v61  ;;  %v491_v7 = vsel %vm454_vm3, %v488_v53, %v490_v3 }
 0x137   :  { %514 = vrot.lane.b32.xlu1 %v459_v63, %s1573_s30  ;;  %658 = vrot.lane.b32.xlu0 %v603_v0, %s1572_s1  ;;  %v605_v63 = vsel %vm596_vm2, %v602_v59, %v604_v56  ;;  %v606_v59 = vrot.slane %v1847_v47, 2 }
 0x138   :  { %688 = vrot.lane.b32.xlu2 %v633_v1, %s1572_s1 }
 0x13b   :  { %v1896_v9 = vpop.f32.mrf.mxu2 }
 0x13c   :  { %v634_v13 = vrot.slane %v1896_v9, 2  ;;  %v492_v14 = vrot.slane %v1896_v9, 1 }
 0x13d   :  { %v1887_v5 = vpop.f32.mrf.mxu0 }
 0x13e   :  { %v635_v17 = vsel %vm596_vm2, %v632_v61, %v634_v13  ;;  %v493_v19 = vsel %vm454_vm3, %v490_v3, %v492_v14  ;;  %v608_v3 = vrot.slane %v1851_v49, 2 }
 0x13f   :  { %518 = vrot.lane.b32.xlu0 %v463_v6, %s1573_s30  ;;  %546 = vrot.lane.b32.xlu1 %v491_v7, %s1573_s30 }
 0x140   :  { %516 = vrot.lane.b32.xlu2 %v461_v10, %s1573_s30  ;;  %v609_v7 = vsel %vm596_vm2, %v606_v59, %v608_v3  ;;  %v611_v28 = vsel %vm596_vm2, %v608_v3, %v610_v24 }
 0x143   :  { %v1970_v53 = vpop.f32.mrf.mxu2 }
 0x144   :  { %v494_v57 = vrot.slane %v1970_v53, 1  ;;  %v636_v10 = vrot.slane %v1970_v53, 2 }
 0x145   :  { %v1910_v15 = vpop.f32.mrf.mxu0 }
 0x146   :  { %v495_v0 = vsel %vm454_vm3, %v492_v14, %v494_v57  ;;  %v469_v14 = vsel %vm454_vm3, %v466_v11, %v468_v8 }
 0x147   :  { %690 = vrot.lane.b32.xlu0 %v635_v17, %s1572_s1 }
 0x148   :  { %548 = vrot.lane.b32.xlu2 %v493_v19, %s1573_s30 }
 0x14b   :  { %v1996_v4 = vpop.f32.mrf.mxu2 }
 0x14c   :  { %v496_v17 = vrot.slane %v1996_v4, 1  ;;  %v638_v19 = vrot.slane %v1996_v4, 2 }
 0x14d   :  { %v1932_v22 = vpop.f32.mrf.mxu0 }
 0x14e   :  { %v497_v20 = vsel %vm454_vm3, %v494_v57, %v496_v17  ;;  %v639_v23 = vsel %vm596_vm2, %v636_v10, %v638_v19 }
 0x153   :  { %v2009_v12 = vpop.f32.mrf.mxu2 }
 0x154   :  { %v640_v18 = vrot.slane %v2009_v12, 2  ;;  %v498_v26 = vrot.slane %v2009_v12, 1 }
 0x155   :  { %v1946_v27 = vpop.f32.mrf.mxu0 }
 0x15b   :  { %v2024_v21 = vpop.f32.mrf.mxu2 }
 0x15c   :  { %v500_v25 = vrot.slane %v2024_v21, 1  ;;  %v642_v3 = vrot.slane %v2024_v21, 2 }
 0x15d   :  { %v1951_v29 = vpop.f32.mrf.mxu0 }
 0x165   :  { %v1953_v31 = vpop.f32.mrf.mxu0 }
 0x166   :  { %v482_v34 = vrot.slane %v1953_v31, 1  ;;  %v624_v35 = vrot.slane %v1953_v31, 2 }
 0x16d   :  { %v1955_v33 = vpop.f32.mrf.mxu0 }
 0x16e   :  { %v484_v37 = vrot.slane %v1955_v33, 1  ;;  %v626_v39 = vrot.slane %v1955_v33, 2 }
 0x170   :  { %v485_v40 = vsel %vm454_vm3, %v482_v34, %v484_v37  ;;  %v629_v43 = vsel %vm596_vm2, %v626_v39, %v628_v52  ;;  %v627_v44 = vsel %vm596_vm2, %v624_v35, %v626_v39  ;;  %v487_v1 = vsel %vm454_vm3, %v484_v37, %v486_v51 }
 0x171   :  { %540 = vrot.lane.b32.xlu1 %v485_v40, %s1573_s30  ;;  %684 = vrot.lane.b32.xlu0 %v629_v43, %s1572_s1  ;;  %v607_v51 = vsel %vm596_vm2, %v604_v56, %v606_v59  ;;  %v501_v37 = vsel %vm454_vm3, %v498_v26, %v500_v25  ;;  %v499_v39 = vsel %vm454_vm3, %v496_v17, %v498_v26  ;;  %v470_v40 = vrot.slane %v1874_v62, 1  ;;  %v2042_v56 = vpop.f32.mrf.mxu2 }
 0x172   :  { %682 = vrot.lane.b32.xlu2 %v627_v44, %s1572_s1  ;;  %v614_v43 = vrot.slane %v1887_v5, 2  ;;  %v612_v44 = vrot.slane %v1874_v62, 2  ;;  %v472_v59 = vrot.slane %v1887_v5, 1  ;;  %v644_v17 = vrot.slane %v2042_v56, 2 }
 0x173   :  { %v655_v54 = vpop.permute.xlu1 %654  ;;  %v513_v52 = vpop.permute.xlu0 %512  ;;  %v471_v57 = vsel %vm454_vm3, %v468_v8, %v470_v40 }
 0x174   :  { %v739_v58 = vsel %vm738_vm1, %v1824_v30, %v513_v52  ;;  %v464_v30 = vrot.slane %v1847_v47, 1  ;;  %v615_v52 = vsel %vm596_vm2, %v612_v44, %v614_v43 }
 0x175   :  { %v768_v61 = vsel %vm767_vm4, %v739_v58, %v655_v54  ;;  %v657_v54 = vpop.permute.xlu2 %656 }
 0x176   :  { %1480 = vmatmul.msk.f32.vlgmr.msra.gmra.mxu1 %vm812_vm5, %v768_v61  ;;  %v465_v6 = vsel %vm454_vm3, %v462_v2, %v464_v30  ;;  %v637_v2 = vsel %vm596_vm2, %v634_v13, %v636_v10  ;;  %v467_v16 = vsel %vm454_vm3, %v464_v30, %v466_v11  ;;  %v641_v13 = vsel %vm596_vm2, %v638_v19, %v640_v18 }
 0x177   :  { %v613_v61 = vsel %vm596_vm2, %v610_v24, %v612_v44  ;;  %v474_v30 = vrot.slane %v1910_v15, 1  ;;  %v476_v44 = vrot.slane %v1932_v22, 1 }
 0x179   :  { %660 = vrot.lane.b32.xlu1 %v605_v63, %s1572_s1  ;;  %550 = vrot.lane.b32.xlu0 %v495_v0, %s1573_s30  ;;  %v475_v8 = vsel %vm454_vm3, %v472_v59, %v474_v30 }
 0x17a   :  { %542 = vrot.lane.b32.xlu2 %v487_v1, %s1573_s30 }
 0x181   :  { %520 = vrot.lane.b32.xlu1 %v465_v6, %s1573_s30  ;;  %664 = vrot.lane.b32.xlu0 %v609_v7, %s1572_s1  ;;  %v2060_v7 = vpop.f32.mrf.mxu2 }
 0x182   :  { %662 = vrot.lane.b32.xlu2 %v607_v51, %s1572_s1  ;;  %v643_v51 = vsel %vm596_vm2, %v640_v18, %v642_v3 }
 0x189   :  { %692 = vrot.lane.b32.xlu1 %v637_v2, %s1572_s1  ;;  %524 = vrot.lane.b32.xlu0 %v469_v14, %s1573_s30  ;;  %v502_v14 = vrot.slane %v2042_v56, 1 }
 0x18a   :  { %522 = vrot.lane.b32.xlu2 %v467_v16, %s1573_s30  ;;  %v646_v16 = vrot.slane %v2060_v7, 2 }
 0x191   :  { %552 = vrot.lane.b32.xlu1 %v497_v20, %s1573_s30  ;;  %696 = vrot.lane.b32.xlu0 %v641_v13, %s1572_s1  ;;  %v503_v20 = vsel %vm454_vm3, %v500_v25, %v502_v14  ;;  %v647_v13 = vsel %vm596_vm2, %v644_v17, %v646_v16 }
 0x192   :  { %694 = vrot.lane.b32.xlu2 %v639_v23, %s1572_s1  ;;  %v2058_v6 = vpop.permute.xlu2 %688  ;;  %v2077_v23 = vpop.f32.mrf.mxu2 }
 0x193   :  { %v506_v25 = vrot.slane %v2077_v23, 1 }
 0x199   :  { %666 = vrot.lane.b32.xlu1 %v611_v28, %s1572_s1  ;;  %556 = vrot.lane.b32.xlu0 %v501_v37, %s1573_s30  ;;  %v616_v28 = vrot.slane %v1910_v15, 2  ;;  %v504_v37 = vrot.slane %v2060_v7, 1 }
 0x19a   :  { %554 = vrot.lane.b32.xlu2 %v499_v39, %s1573_s30  ;;  %v517_v18 = vpop.permute.xlu2 %516 }
 0x19b   :  { %v741_v24 = vsel %vm738_vm1, %v1838_v42, %v517_v18  ;;  %v617_v39 = vsel %vm596_vm2, %v614_v43, %v616_v28  ;;  %v505_v42 = vsel %vm454_vm3, %v502_v14, %v504_v37 }
 0x1a1   :  { %v687_v58 = vpop.permute.xlu1 %686  ;;  %526 = vrot.lane.b32.xlu1 %v471_v57, %s1573_s30  ;;  %670 = vrot.lane.b32.xlu0 %v615_v52, %s1572_s1  ;;  %v545_v63 = vpop.permute.xlu0 %544  ;;  %v618_v57 = vrot.slane %v1932_v22, 2  ;;  %v477_v52 = vsel %vm454_vm3, %v474_v30, %v476_v44 }
 0x1a2   :  { %668 = vrot.lane.b32.xlu2 %v613_v61, %s1572_s1  ;;  %v755_v0 = vsel %vm738_vm1, %v1849_v48, %v545_v63  ;;  %v473_v48 = vsel %vm454_vm3, %v470_v40, %v472_v59  ;;  %v507_v40 = vsel %vm454_vm3, %v504_v37, %v506_v25  ;;  %v480_v61 = vrot.slane %v1951_v29, 1 }
 0x1a3   :  { %v2053_v1 = vsel %vm767_vm4, %v755_v0, %v687_v58  ;;  %v619_v58 = vsel %vm596_vm2, %v616_v28, %v618_v57  ;;  %v648_v63 = vrot.slane %v2077_v23, 2  ;;  %v2107_v0 = vpop.permute.xlu2 %548 }
 0x1a4   :  { %v483_v37 = vsel %vm454_vm3, %v480_v61, %v482_v34 }
 0x1a5   :  { %v649_v30 = vsel %vm596_vm2, %v646_v16, %v648_v63 }
 0x1a9   :  { %v515_v10 = vpop.permute.xlu1 %514  ;;  %698 = vrot.lane.b32.xlu1 %v643_v51, %s1572_s1  ;;  %530 = vrot.lane.b32.xlu0 %v475_v8, %s1573_s30  ;;  %v659_v19 = vpop.permute.xlu0 %658 }
 0x1aa   :  { %v740_v11 = vsel %vm738_vm1, %v1828_v32, %v515_v10  ;;  %528 = vrot.lane.b32.xlu2 %v473_v48, %s1573_s30  ;;  %v645_v32 = vsel %vm596_vm2, %v642_v3, %v644_v17  ;;  %v770_v26 = vsel %vm767_vm4, %v741_v24, %v659_v19  ;;  %v478_v3 = vrot.slane %v1946_v27, 1  ;;  %v2112_v51 = vpop.f32.mrf.mxu2 }
 0x1ab   :  { %v769_v2 = vsel %vm767_vm4, %v740_v11, %v657_v54  ;;  %v620_v54 = vrot.slane %v1946_v27, 2  ;;  %v508_v10 = vrot.slane %v2112_v51, 1  ;;  %v650_v48 = vrot.slane %v2112_v51, 2 }
 0x1ac   :  { %1481 = vmatmul.msk.f32.gmra.mxu1 %vm812_vm5, %v769_v2  ;;  %v481_v59 = vsel %vm454_vm3, %v478_v3, %v480_v61  ;;  %v479_v8 = vsel %vm454_vm3, %v476_v44, %v478_v3  ;;  %v652_v2 = vrot.slane %v1571_v41, 2  ;;  %v622_v19 = vrot.slane %v1951_v29, 2 }
 0x1ad   :  { %v621_v43 = vsel %vm596_vm2, %v618_v57, %v620_v54  ;;  %v509_v16 = vsel %vm454_vm3, %v506_v25, %v508_v10  ;;  %v651_v18 = vsel %vm596_vm2, %v648_v63, %v650_v48 }
 0x1ae   :  { %v653_v14 = vsel %vm596_vm2, %v650_v48, %v652_v2 }
 0x1b1   :  { %558 = vrot.lane.b32.xlu1 %v503_v20, %s1573_s30  ;;  %702 = vrot.lane.b32.xlu0 %v647_v13, %s1572_s1  ;;  %v519_v17 = vpop.permute.xlu0 %518  ;;  %v510_v13 = vrot.slane %v1571_v41, 1 }
 0x1b2   :  { %700 = vrot.lane.b32.xlu2 %v645_v32, %s1572_s1  ;;  %v623_v32 = vsel %vm596_vm2, %v620_v54, %v622_v19  ;;  %v742_v34 = vsel %vm738_vm1, %v1843_v45, %v519_v17 }
 0x1b3   :  { %v511_v24 = vsel %vm454_vm3, %v508_v10, %v510_v13 }
 0x1b4   :  { %1482 = vmatmul.msk.f32.gmra.mxu1 %vm812_vm5, %v770_v26  ;;  %v547_v26 = vpop.permute.xlu1 %546 }
 0x1b9   :  { %672 = vrot.lane.b32.xlu1 %v617_v39, %s1572_s1  ;;  %562 = vrot.lane.b32.xlu0 %v507_v40, %s1573_s30  ;;  %v691_v28 = vpop.permute.xlu0 %690  ;;  %v625_v39 = vsel %vm596_vm2, %v622_v19, %v624_v35 }
 0x1ba   :  { %560 = vrot.lane.b32.xlu2 %v505_v42, %s1573_s30 }
 0x1c1   :  { %532 = vrot.lane.b32.xlu1 %v477_v52, %s1573_s30  ;;  %676 = vrot.lane.b32.xlu0 %v621_v43, %s1572_s1 }
 0x1c2   :  { %674 = vrot.lane.b32.xlu2 %v619_v58, %s1572_s1 }
 0x1c9   :  { %704 = vrot.lane.b32.xlu1 %v649_v30, %s1572_s1  ;;  %536 = vrot.lane.b32.xlu0 %v481_v59, %s1573_s30  ;;  %v756_v59 = vsel %vm738_vm1, %v1853_v50, %v547_v26  ;;  %v757_v50 = vsel %vm738_vm1, %v1871_v60, %v2107_v0 }
 0x1ca   :  { %534 = vrot.lane.b32.xlu2 %v479_v8, %s1573_s30 }
 0x1cc   :  { %v683_v11 = vpop.permute.xlu2 %682 }
 0x1d1   :  { %708 = vrot.lane.b32.xlu0 %v653_v14, %s1572_s1  ;;  %564 = vrot.lane.b32.xlu1 %v509_v16, %s1573_s30  ;;  %v786_v16 = vsel %vm767_vm4, %v757_v50, %v691_v28 }
 0x1d2   :  { %706 = vrot.lane.b32.xlu2 %v651_v18, %s1572_s1 }
 0x1d4   :  { %v543_v20 = vpop.permute.xlu2 %542 }
 0x1d5   :  { %v754_v35 = vsel %vm738_vm1, %v1955_v33, %v543_v20 }
 0x1d9   :  { %678 = vrot.lane.b32.xlu1 %v623_v32, %s1572_s1 }
 0x1da   :  { %566 = vrot.lane.b32.xlu2 %v511_v24, %s1573_s30 }
 0x1dc   :  { %v663_v25 = vpop.permute.xlu2 %662 }
 0x1e1   :  { %538 = vrot.lane.b32.xlu1 %v483_v37, %s1573_s30 }
 0x1e2   :  { %680 = vrot.lane.b32.xlu2 %v625_v39, %s1572_s1 }
 0x1e3   :  { %v541_v40 = vpop.permute.xlu1 %540  ;;  %v685_v42 = vpop.permute.xlu0 %684 }
 0x1e4   :  { %v753_v44 = vsel %vm738_vm1, %v1953_v31, %v541_v40  ;;  %v523_v54 = vpop.permute.xlu2 %522  ;;  %v783_v61 = vsel %vm767_vm4, %v754_v35, %v685_v42  ;;  %v2198_v40 = vshrl.u32 %v58_v36, 7  ;;  %v1574_v35 = vmov 14  }
 0x1e5   :  { %v782_v57 = vsel %vm767_vm4, %v753_v44, %v683_v11  ;;  %v744_v48 = vsel %vm738_vm1, %v1847_v47, %v523_v54 }
 0x1e6   :  { %1494 = vmatmul.msk.f32.vlgmr.msra.gmra.mxu3 %vm812_vm5, %v782_v57  ;;  %v2206_v57 = vadd.s32 8, %v2198_v40 }
 0x1eb   :  { %v661_v52 = vpop.permute.xlu1 %660  ;;  %v551_v43 = vpop.permute.xlu0 %550 }
 0x1ec   :  { %v771_v58 = vsel %vm767_vm4, %v742_v34, %v661_v52  ;;  %v695_v31 = vpop.permute.xlu2 %694  ;;  %v758_v18 = vsel %vm738_vm1, %v1896_v9, %v551_v43  ;;  %v1056_v43 = vand.u32 15, %v2206_v57 }
 0x1ed   :  { %1483 = vmatmul.msk.f32.gmra.mxu1 %vm812_vm5, %v771_v58  ;;  %v2217_v58 = vsel %vm1083_vm6, 15, %v1574_v35 }
 0x1ee   :  { %1495 = vmatmul.msk.f32.gmra.mxu3 %vm812_vm5, %v783_v61  ;;  %vm1086_vm7 = vcmp.lt.s32.totalorder %v1056_v43, %v2217_v58 }
 0x1f3   :  { %v521_v63 = vpop.permute.xlu1 %520  ;;  %v665_v3 = vpop.permute.xlu0 %664 }
 0x1f4   :  { %v743_v30 = vsel %vm738_vm1, %v1845_v46, %v521_v63  ;;  %v555_v33 = vpop.permute.xlu2 %554  ;;  %v773_v11 = vsel %vm767_vm4, %v744_v48, %v665_v3  ;;  %v785_v46 = vsel %vm767_vm4, %v756_v59, %v2058_v6  ;;  %v914_v42 = vpop.f32.mrf.mxu1 }
 0x1f5   :  { %v772_v45 = vsel %vm767_vm4, %v743_v30, %v663_v25  ;;  %v760_v37 = vsel %vm738_vm1, %v1996_v4, %v555_v33  ;;  %v2203_v4 = vld [vmem:[%s2416_s3] ss:$0 sm:$0xff] }
 0x1f6   :  { %1484 = vmatmul.msk.f32.gmra.mxu1 %vm812_vm5, %v772_v45  ;;  %1496 = vmatmul.msk.f32.gmra.mxu3 %vm812_vm5, %v2053_v1  ;;  %v915_v36 = vadd.f32 %v2203_v4, %v914_v42 }
 0x1f8   :  { %v998_v63 = vmax.f32 %v915_v36, 0.0 }
 0x1fa   :  { %v1142_v48 = vsel %vm1141_vm8, %v998_v63, -inf }
 0x1fb   :  { %v693_v8 = vpop.permute.xlu1 %692  ;;  %v525_v10 = vpop.permute.xlu0 %524 }
 0x1fc   :  { %v669_v2 = vpop.permute.xlu2 %668  ;;  %v745_v47 = vsel %vm738_vm1, %v1851_v49, %v525_v10  ;;  %v787_v13 = vsel %vm767_vm4, %v758_v18, %v693_v8 }
 0x1fe   :  { %1485 = vmatmul.msk.f32.gmra.mxu1 %vm812_vm5, %v773_v11  ;;  %1497 = vmatmul.msk.f32.gmra.mxu3 %vm812_vm5, %v785_v46 }
 0x203   :  { %v553_v1 = vpop.permute.xlu1 %552  ;;  %v697_v14 = vpop.permute.xlu0 %696 }
 0x204   :  { %v529_v20 = vpop.permute.xlu2 %528  ;;  %v759_v60 = vsel %vm738_vm1, %v1970_v53, %v553_v1 }
 0x205   :  { %v788_v9 = vsel %vm767_vm4, %v759_v60, %v695_v31  ;;  %v747_v53 = vsel %vm738_vm1, %v1874_v62, %v529_v20 }
 0x206   :  { %1498 = vmatmul.msk.f32.gmra.mxu3 %vm812_vm5, %v786_v16 }
 0x20b   :  { %v667_v17 = vpop.permute.xlu1 %666  ;;  %v557_v6 = vpop.permute.xlu0 %556 }
 0x20c   :  { %v774_v19 = vsel %vm767_vm4, %v745_v47, %v667_v17  ;;  %v701_v26 = vpop.permute.xlu2 %700  ;;  %v761_v34 = vsel %vm738_vm1, %v2009_v12, %v557_v6 }
 0x20d   :  { %1486 = vmatmul.msk.f32.gmra.mxu1 %vm812_vm5, %v774_v19 }
 0x20e   :  { %1499 = vmatmul.msk.f32.gmra.mxu3 %vm812_vm5, %v787_v13 }
 0x213   :  { %v527_v0 = vpop.permute.xlu1 %526  ;;  %v671_v32 = vpop.permute.xlu0 %670 }
 0x214   :  { %v746_v49 = vsel %vm738_vm1, %v1859_v55, %v527_v0  ;;  %v776_v39 = vsel %vm767_vm4, %v747_v53, %v671_v32  ;;  %v789_v55 = vsel %vm767_vm4, %v760_v37, %v697_v14  ;;  %v561_v44 = vpop.permute.xlu2 %560 }
 0x215   :  { %v775_v24 = vsel %vm767_vm4, %v746_v49, %v669_v2  ;;  %v763_v2 = vsel %vm738_vm1, %v2042_v56, %v561_v44 }
 0x216   :  { %1487 = vmatmul.msk.f32.gmra.mxu1 %vm812_vm5, %v775_v24  ;;  %1500 = vmatmul.msk.f32.gmra.mxu3 %vm812_vm5, %v788_v9 }
 0x21b   :  { %v699_v28 = vpop.permute.xlu1 %698  ;;  %v531_v25 = vpop.permute.xlu0 %530 }
 0x21c   :  { %v790_v52 = vsel %vm767_vm4, %v761_v34, %v699_v28  ;;  %v675_v3 = vpop.permute.xlu2 %674  ;;  %v748_v30 = vsel %vm738_vm1, %v1887_v5, %v531_v25 }
 0x21e   :  { %1488 = vmatmul.msk.f32.gmra.mxu1 %vm812_vm5, %v776_v39  ;;  %1501 = vmatmul.msk.f32.gmra.mxu3 %vm812_vm5, %v789_v55 }
 0x223   :  { %v559_v54 = vpop.permute.xlu1 %558  ;;  %v703_v62 = vpop.permute.xlu0 %702 }
 0x224   :  { %v762_v31 = vsel %vm738_vm1, %v2024_v21, %v559_v54  ;;  %v535_v14 = vpop.permute.xlu2 %534  ;;  %v792_v16 = vsel %vm767_vm4, %v763_v2, %v703_v62  ;;  %v1042_v62 = vadd.s32 120, %v2198_v40 }
 0x225   :  { %v791_v10 = vsel %vm767_vm4, %v762_v31, %v701_v26  ;;  %v750_v56 = vsel %vm738_vm1, %v1932_v22, %v535_v14 }
 0x226   :  { %1502 = vmatmul.msk.f32.gmra.mxu3 %vm812_vm5, %v790_v52  ;;  %v1070_v35 = vand.u32 15, %v1042_v62  ;;  %v1046_v62 = vadd.s32 152, %v2198_v40 }
 0x228   :  { %vm1100_vm10 = vcmp.lt.s32.totalorder %v1070_v35, %v2217_v58 }
 0x229   :  { %v917_v61 = vpop.f32.mrf.mxu1 }
 0x22a   :  { %v918_v12 = vadd.f32 %v2203_v4, %v917_v61 }
 0x22b   :  { %v673_v45 = vpop.permute.xlu1 %672  ;;  %v563_v59 = vpop.permute.xlu0 %562 }
 0x22c   :  { %v999_v33 = vmax.f32 %v918_v12, 0.0  ;;  %v777_v8 = vsel %vm767_vm4, %v748_v30, %v673_v45  ;;  %v764_v17 = vsel %vm738_vm1, %v2060_v7, %v563_v59  ;;  %v707_v19 = vpop.permute.xlu2 %706 }
 0x22d   :  { %1489 = vmatmul.msk.f32.gmra.mxu1 %vm812_vm5, %v777_v8 }
 0x22e   :  { %v1114_v21 = vsel %vm1086_vm7, %v999_v33, 0.0  ;;  %1503 = vmatmul.msk.f32.gmra.mxu3 %vm812_vm5, %v791_v10 }
 0x22f   :  { %v1143_v11 = vsel %vm1141_vm8, %v1114_v21, -inf }
 0x230   :  { %v1144_v5 = vmax.f32 %v1142_v48, %v1143_v11  ;;  %v1032_v48 = vadd.s32 40, %v2198_v40 }
 0x232   :  { %v1145_v55 = vrot.slane %v1144_v5, 4 }
 0x233   :  { %v533_v46 = vpop.permute.xlu1 %532  ;;  %v677_v47 = vpop.permute.xlu0 %676 }
 0x234   :  { %v749_v1 = vsel %vm738_vm1, %v1910_v15, %v533_v46  ;;  %v779_v15 = vsel %vm767_vm4, %v750_v56, %v677_v47  ;;  %v567_v0 = vpop.permute.xlu2 %566 }
 0x235   :  { %v778_v50 = vsel %vm767_vm4, %v749_v1, %v675_v3  ;;  %v766_v24 = vsel %vm738_vm1, %v2112_v51, %v567_v0  ;;  %v1030_v51 = vadd.s32 24, %v2198_v40 }
 0x236   :  { %1490 = vmatmul.msk.f32.gmra.mxu1 %vm812_vm5, %v778_v50  ;;  %1504 = vmatmul.msk.f32.gmra.mxu3 %vm812_vm5, %v792_v16 }
 0x237   :  { %v1058_v39 = vand.u32 15, %v1030_v51 }
 0x239   :  { %vm1088_vm9 = vcmp.lt.s32.totalorder %v1058_v39, %v2217_v58 }
 0x23b   :  { %v705_v6 = vpop.permute.xlu1 %704  ;;  %v537_v20 = vpop.permute.xlu0 %536 }
 0x23c   :  { %v793_v18 = vsel %vm767_vm4, %v764_v17, %v705_v6  ;;  %v751_v32 = vsel %vm738_vm1, %v1946_v27, %v537_v20  ;;  %v681_v28 = vpop.permute.xlu2 %680  ;;  %v920_v27 = vpop.f32.mrf.mxu1  ;;  %v1060_v17 = vand.u32 15, %v1032_v48 }
 0x23d   :  { %v921_v53 = vadd.f32 %v2203_v4, %v920_v27 }
 0x23e   :  { %1491 = vmatmul.msk.f32.gmra.mxu1 %vm812_vm5, %v779_v15  ;;  %1505 = vmatmul.msk.f32.gmra.mxu3 %vm812_vm5, %v793_v18  ;;  %v1044_v18 = vadd.s32 136, %v2198_v40  ;;  %vm1090_vm12 = vcmp.lt.s32.totalorder %v1060_v17, %v2217_v58 }
 0x23f   :  { %v1000_v34 = vmax.f32 %v921_v53, 0.0 }
 0x241   :  { %v1151_v61 = vsel %vm1141_vm8, %v1000_v34, -inf }
 0x243   :  { %v565_v13 = vpop.permute.xlu1 %564  ;;  %v709_v22 = vpop.permute.xlu0 %708 }
 0x244   :  { %v765_v60 = vsel %vm738_vm1, %v2077_v23, %v565_v13  ;;  %v795_v26 = vsel %vm767_vm4, %v766_v24, %v709_v22  ;;  %v1072_v22 = vand.u32 15, %v1044_v18 }
 0x245   :  { %v794_v7 = vsel %vm767_vm4, %v765_v60, %v707_v19 }
 0x246   :  { %1506 = vmatmul.msk.f32.gmra.mxu3 %vm812_vm5, %v794_v7  ;;  %vm1102_vm13 = vcmp.lt.s32.totalorder %v1072_v22, %v2217_v58  ;;  %v1036_v22 = vadd.s32 72, %v2198_v40 }
 0x24b   :  { %v679_v49 = vpop.permute.xlu1 %678 }
 0x24c   :  { %v780_v9 = vsel %vm767_vm4, %v751_v32, %v679_v49 }
 0x24d   :  { %1492 = vmatmul.msk.f32.gmra.mxu1 %vm812_vm5, %v780_v9 }
 0x24e   :  { %1507 = vmatmul.msk.f32.gmra.mxu3 %vm812_vm5, %v795_v26 }
 0x253   :  { %v539_v23 = vpop.permute.xlu1 %538 }
 0x254   :  { %v752_v25 = vsel %vm738_vm1, %v1951_v29, %v539_v23  ;;  %v1146_v29 = vmax.f32 %v1144_v5, %v1145_v55 }
 0x255   :  { %v781_v37 = vsel %vm767_vm4, %v752_v25, %v681_v28 }
 0x256   :  { %1493 = vmatmul.msk.f32.gmra.mxu1 %vm812_vm5, %v781_v37  ;;  %v1147_v12 = vrot.slane %v1146_v29, 2 }
 0x258   :  { %v1148_v10 = vmax.f32 %v1146_v29, %v1147_v12 }
 0x25a   :  { %v1149_v14 = vrot.slane %v1148_v10, 1 }
 0x25c   :  { %v1150_v19 = vmax.f32 %v1148_v10, %v1149_v14 }
 0x269   :  { %v956_v42 = vpop.f32.mrf.mxu3 }
 0x26a   :  { %v923_v44 = vpop.f32.mrf.mxu1  ;;  %v957_v36 = vadd.f32 %v2203_v4, %v956_v42 }
 0x26b   :  { %v924_v54 = vadd.f32 %v2203_v4, %v923_v44 }
 0x26c   :  { %v1012_v45 = vmax.f32 %v957_v36, 0.0 }
 0x26d   :  { %v1001_v52 = vmax.f32 %v924_v54, 0.0 }
 0x26e   :  { %v1205_v5 = vsel %vm1141_vm8, %v1012_v45, -inf }
 0x26f   :  { %v1116_v43 = vsel %vm1088_vm9, %v1001_v52, 0.0 }
 0x270   :  { %v1152_v31 = vsel %vm1141_vm8, %v1116_v43, -inf  ;;  %v1074_v43 = vand.u32 15, %v1046_v62 }
 0x271   :  { %v1153_v63 = vmax.f32 %v1151_v61, %v1152_v31  ;;  %v959_v3 = vpop.f32.mrf.mxu3 }
 0x272   :  { %v960_v30 = vadd.f32 %v2203_v4, %v959_v3  ;;  %vm1104_vm14 = vcmp.lt.s32.totalorder %v1074_v43, %v2217_v58 }
 0x273   :  { %v1154_v33 = vrot.slane %v1153_v63, 4  ;;  %v926_v59 = vpop.f32.mrf.mxu1 }
 0x274   :  { %v1013_v8 = vmax.f32 %v960_v30, 0.0  ;;  %v927_v16 = vadd.f32 %v2203_v4, %v926_v59 }
 0x275   :  { %v1155_v21 = vmax.f32 %v1153_v63, %v1154_v33 }
 0x276   :  { %v1128_v11 = vsel %vm1100_vm10, %v1013_v8, 0.0  ;;  %v1002_v13 = vmax.f32 %v927_v16, 0.0 }
 0x277   :  { %v1156_v46 = vrot.slane %v1155_v21, 2  ;;  %v1206_v2 = vsel %vm1141_vm8, %v1128_v11, -inf }
 0x278   :  { %v2276_v1 = vmax.f32 %v1205_v5, %v1206_v2  ;;  %v1160_v49 = vsel %vm1141_vm8, %v1002_v13, -inf }
 0x279   :  { %v1157_v50 = vmax.f32 %v1155_v21, %v1156_v46  ;;  %v962_v47 = vpop.f32.mrf.mxu3 }
 0x27a   :  { %v963_v0 = vadd.f32 %v2203_v4, %v962_v47 }
 0x27b   :  { %v1158_v6 = vrot.slane %v1157_v50, 1  ;;  %v929_v56 = vpop.f32.mrf.mxu1 }
 0x27c   :  { %v930_v15 = vadd.f32 %v2203_v4, %v929_v56  ;;  %v1014_v28 = vmax.f32 %v963_v0, 0.0  ;;  %v1034_v0 = vadd.s32 56, %v2198_v40 }
 0x27d   :  { %v1159_v20 = vmax.f32 %v1157_v50, %v1158_v6 }
 0x27e   :  { %v1003_v60 = vmax.f32 %v930_v15, 0.0  ;;  %v1214_v53 = vsel %vm1141_vm8, %v1014_v28, -inf }
 0x27f   :  { %v1269_v7 = vsel %vm1268_vm11, %v1150_v19, %v1159_v20 }
 0x280   :  { %v1118_v32 = vsel %vm1090_vm12, %v1003_v60, 0.0  ;;  %v1048_v60 = vadd.s32 168, %v2198_v40 }
 0x281   :  { %v1161_v24 = vsel %vm1141_vm8, %v1118_v32, -inf  ;;  %v965_v9 = vpop.f32.mrf.mxu3 }
 0x282   :  { %v1162_v26 = vmax.f32 %v1160_v49, %v1161_v24  ;;  %v966_v23 = vadd.f32 %v2203_v4, %v965_v9  ;;  %v1076_v24 = vand.u32 15, %v1048_v60 }
 0x284   :  { %v1163_v25 = vrot.slane %v1162_v26, 4  ;;  %v1015_v37 = vmax.f32 %v966_v23, 0.0  ;;  %vm1106_vm15 = vcmp.lt.s32.totalorder %v1076_v24, %v2217_v58 }
 0x286   :  { %v1164_v27 = vmax.f32 %v1162_v26, %v1163_v25  ;;  %v1130_v51 = vsel %vm1102_vm13, %v1015_v37, 0.0  ;;  %v1038_v26 = vadd.s32 88, %v2198_v40  ;;  %v1052_v37 = vadd.s32 200, %v2198_v40 }
 0x287   :  { %v1215_v39 = vsel %vm1141_vm8, %v1130_v51, -inf  ;;  %vm1271_vm13 = vcmask 1042432  }
 0x288   :  { %v1165_v55 = vrot.slane %v1164_v27, 2  ;;  %v1216_v42 = vmax.f32 %v1214_v53, %v1215_v39  ;;  %v1064_v53 = vand.u32 15, %v1036_v22  ;;  %v1066_v62 = vand.u32 15, %v1038_v26 }
 0x289   :  { %v968_v44 = vpop.f32.mrf.mxu3 }
 0x28a   :  { %v1166_v54 = vmax.f32 %v1164_v27, %v1165_v55  ;;  %v932_v52 = vpop.f32.mrf.mxu1  ;;  %v969_v36 = vadd.f32 %v2203_v4, %v968_v44  ;;  %v1217_v61 = vrot.slane %v1216_v42, 4  ;;  %v1062_v27 = vand.u32 15, %v1034_v0 }
 0x28b   :  { %v933_v44 = vadd.f32 %v2203_v4, %v932_v52  ;;  %vm2320_vm7 = vcmp.lt.s32.totalorder %v1064_v53, %v2217_v58  ;;  %vm1096_vm9 = vcmp.lt.s32.totalorder %v1066_v62, %v2217_v58 }
 0x28c   :  { %v1167_v34 = vrot.slane %v1166_v54, 1  ;;  %v1016_v63 = vmax.f32 %v969_v36, 0.0  ;;  %v1218_v3 = vmax.f32 %v1216_v42, %v1217_v61  ;;  %v1080_v36 = vand.u32 15, %v1052_v37 }
 0x28d   :  { %vm1092_vm5 = vcmp.lt.s32.totalorder %v1062_v27, %v2217_v58  ;;  %v1054_v37 = vadd.s32 216, %v2198_v40 }
 0x28e   :  { %v1168_v29 = vmax.f32 %v1166_v54, %v1167_v34  ;;  %v1223_v33 = vsel %vm1141_vm8, %v1016_v63, -inf  ;;  %v1219_v8 = vrot.slane %v1218_v3, 2  ;;  %vm1110_vm10 = vcmp.lt.s32.totalorder %v1080_v36, %v2217_v58 }
 0x28f   :  { %v1082_v62 = vand.u32 15, %v1054_v37 }
 0x290   :  { %v2293_v35 = vsel %vm320_vm0, %v1269_v7, %v1168_v29  ;;  %v1220_v5 = vmax.f32 %v1218_v3, %v1219_v8  ;;  %v1050_v7 = vadd.s32 184, %v2198_v40  ;;  %v1004_v8 = vmax.f32 %v933_v44, 0.0 }
 0x291   :  { %v971_v31 = vpop.f32.mrf.mxu3 }
 0x292   :  { %v972_v12 = vadd.f32 %v2203_v4, %v971_v31  ;;  %v1221_v14 = vrot.slane %v1220_v5, 1  ;;  %v1078_v28 = vand.u32 15, %v1050_v7 }
 0x293   :  { %v935_v21 = vpop.f32.mrf.mxu1 }
 0x294   :  { %v1017_v30 = vmax.f32 %v972_v12, 0.0  ;;  %v1222_v6 = vmax.f32 %v1220_v5, %v1221_v14  ;;  %v936_v23 = vadd.f32 %v2203_v4, %v935_v21  ;;  %vm1108_vm4 = vcmp.lt.s32.totalorder %v1078_v28, %v2217_v58 }
 0x296   :  { %v1132_v45 = vsel %vm1104_vm14, %v1017_v30, 0.0  ;;  %v1005_v34 = vmax.f32 %v936_v23, 0.0  ;;  %vm1273_vm14 = vcmask 1043456  }
 0x297   :  { %v1224_v59 = vsel %vm1141_vm8, %v1132_v45, -inf }
 0x298   :  { %v1225_v10 = vmax.f32 %v1223_v33, %v1224_v59 }
 0x299   :  { %v974_v48 = vpop.f32.mrf.mxu3 }
 0x29a   :  { %v1226_v11 = vrot.slane %v1225_v10, 4  ;;  %v975_v39 = vadd.f32 %v2203_v4, %v974_v48 }
 0x29b   :  { %v938_v17 = vpop.f32.mrf.mxu1 }
 0x29c   :  { %v1227_v46 = vmax.f32 %v1225_v10, %v1226_v11  ;;  %v1018_v31 = vmax.f32 %v975_v39, 0.0  ;;  %v939_v12 = vadd.f32 %v2203_v4, %v938_v17  ;;  %v1120_v10 = vsel %vm1092_vm5, %v1005_v34, 0.0 }
 0x29d   :  { %v1040_v39 = vadd.s32 104, %v2198_v40 }
 0x29e   :  { %v1228_v2 = vrot.slane %v1227_v46, 2 }
 0x2a0   :  { %v1229_v50 = vmax.f32 %v1227_v46, %v1228_v2  ;;  %v1006_v2 = vmax.f32 %v939_v12, 0.0 }
 0x2a1   :  { %v977_v16 = vpop.f32.mrf.mxu3 }
 0x2a2   :  { %v1230_v47 = vrot.slane %v1229_v50, 1  ;;  %v978_v32 = vadd.f32 %v2203_v4, %v977_v16  ;;  %v1170_v16 = vsel %vm1141_vm8, %v1120_v10, -inf }
 0x2a4   :  { %v1231_v56 = vmax.f32 %v1229_v50, %v1230_v47  ;;  %v1019_v55 = vmax.f32 %v978_v32, 0.0  ;;  %v1232_v47 = vsel %vm1141_vm8, %v1018_v31, -inf  ;;  %v1178_v32 = vsel %vm1141_vm8, %v1006_v2, -inf }
 0x2a5   :  { %v1208_v31 = vrot.slane %v2276_v1, 4 }
 0x2a6   :  { %v2300_v18 = vsel %vm1268_vm11, %v1222_v6, %v1231_v56  ;;  %v1134_v63 = vsel %vm1106_vm15, %v1019_v55, 0.0  ;;  %vm1112_vm11 = vcmp.lt.s32.totalorder %v1082_v62, %v2217_v58  ;;  %vm1275_vm15 = vcmask 1044480  }
 0x2a7   :  { %v1233_v48 = vsel %vm1141_vm8, %v1134_v63, -inf }
 0x2a8   :  { %v1234_v56 = vmax.f32 %v1232_v47, %v1233_v48 }
 0x2a9   :  { %v980_v15 = vpop.f32.mrf.mxu3 }
 0x2aa   :  { %v941_v19 = vpop.f32.mrf.mxu1  ;;  %v981_v29 = vadd.f32 %v2203_v4, %v980_v15  ;;  %v1235_v28 = vrot.slane %v1234_v56, 4 }
 0x2ab   :  { %v942_v51 = vadd.f32 %v2203_v4, %v941_v19 }
 0x2ac   :  { %v1020_v21 = vmax.f32 %v981_v29, 0.0 }
 0x2ad   :  { %v1007_v43 = vmax.f32 %v942_v51, 0.0 }
 0x2ae   :  { %v1241_v15 = vsel %vm1141_vm8, %v1020_v21, -inf }
 0x2af   :  { %v1122_v11 = vsel %vm2320_vm7, %v1007_v43, 0.0 }
 0x2b0   :  { %v1179_v19 = vsel %vm1141_vm8, %v1122_v11, -inf  ;;  %v1316_v11 = vld [vmem:[%s2417_s4 + $0x28] sm:$0xff] }
 0x2b1   :  { %v983_v20 = vpop.f32.mrf.mxu3  ;;  %1338 = vmatpush.msrb.mxu2 %v1316_v11 }
 0x2b2   :  { %v984_v9 = vadd.f32 %v2203_v4, %v983_v20 }
 0x2b3   :  { %v944_v13 = vpop.f32.mrf.mxu1 }
 0x2b4   :  { %v1021_v54 = vmax.f32 %v984_v9, 0.0  ;;  %v945_v33 = vadd.f32 %v2203_v4, %v944_v13  ;;  %v1169_v13 = vsel %vm1141_vm8, %v1004_v8, -inf  ;;  %v1180_v9 = vmax.f32 %v1178_v32, %v1179_v19 }
 0x2b5   :  { %v1171_v22 = vmax.f32 %v1169_v13, %v1170_v16 }
 0x2b6   :  { %v1136_v45 = vsel %vm1108_vm4, %v1021_v54, 0.0  ;;  %v1008_v17 = vmax.f32 %v945_v33, 0.0  ;;  %v1181_v55 = vrot.slane %v1180_v9, 4 }
 0x2b7   :  { %v1242_v14 = vsel %vm1141_vm8, %v1136_v45, -inf  ;;  %v1172_v51 = vrot.slane %v1171_v22, 4 }
 0x2b8   :  { %v1243_v60 = vmax.f32 %v1241_v15, %v1242_v14  ;;  %v1187_v26 = vsel %vm1141_vm8, %v1008_v17, -inf  ;;  %v1182_v12 = vmax.f32 %v1180_v9, %v1181_v55  ;;  %v1314_v17 = vld [vmem:[%s2417_s4 + $0x18] sm:$0xff]  ;;  %v1312_v9 = vld [vmem:[%s2417_s4 + $0x8] sm:$0xff] }
 0x2b9   :  { %v986_v49 = vpop.f32.mrf.mxu3  ;;  %v1173_v29 = vmax.f32 %v1171_v22, %v1172_v51 }
 0x2ba   :  { %v987_v52 = vadd.f32 %v2203_v4, %v986_v49  ;;  %v1244_v27 = vrot.slane %v1243_v60, 4  ;;  %v1183_v2 = vrot.slane %v1182_v12, 2 }
 0x2bb   :  { %v947_v25 = vpop.f32.mrf.mxu1  ;;  %v1174_v10 = vrot.slane %v1173_v29, 2 }
 0x2bc   :  { %v948_v42 = vadd.f32 %v2203_v4, %v947_v25  ;;  %v1022_v5 = vmax.f32 %v987_v52, 0.0  ;;  %v1245_v34 = vmax.f32 %v1243_v60, %v1244_v27  ;;  %v1068_v52 = vand.u32 15, %v1040_v39  ;;  %v1313_v60 = vld [vmem:[%s2417_s4 + $0x10] sm:$0xff] }
 0x2bd   :  { %v1175_v19 = vmax.f32 %v1173_v29, %v1174_v10 }
 0x2be   :  { %v1009_v3 = vmax.f32 %v948_v42, 0.0  ;;  %v1250_v7 = vsel %vm1141_vm8, %v1022_v5, -inf  ;;  %v1236_v42 = vmax.f32 %v1234_v56, %v1235_v28  ;;  %v1246_v33 = vrot.slane %v1245_v34, 2  ;;  %v1315_v5 = vld [vmem:[%s2417_s4 + $0x20] sm:$0xff] }
 0x2bf   :  { %vm1098_vm12 = vcmp.lt.s32.totalorder %v1068_v52, %v2217_v58  ;;  %1339 = vmatpush.msrb.mxu2 %v1315_v5 }
 0x2c0   :  { %v1124_v50 = vsel %vm1096_vm9, %v1009_v3, 0.0  ;;  %v1237_v3 = vrot.slane %v1236_v42, 2 }
 0x2c1   :  { %v989_v30 = vpop.f32.mrf.mxu3  ;;  %v1188_v0 = vsel %vm1141_vm8, %v1124_v50, -inf  ;;  %1340 = vmatpush.msrb.mxu2 %v1314_v17 }
 0x2c2   :  { %v990_v59 = vadd.f32 %v2203_v4, %v989_v30  ;;  %v1189_v25 = vmax.f32 %v1187_v26, %v1188_v0 }
 0x2c3   :  { %1341 = vmatpush.msrb.mxu2 %v1313_v60  ;;  %v1542_v60 = vld [vmem:[%s2418_s5] ss:$0 sm:$0xff] }
 0x2c4   :  { %v1023_v46 = vmax.f32 %v990_v59, 0.0  ;;  %v1190_v44 = vrot.slane %v1189_v25, 4 }
 0x2c5   :  { %1342 = vmatpush.msrb.mxu2 %v1312_v9  ;;  %v1576_v9 = vmov 10  }
 0x2c6   :  { %v1138_v6 = vsel %vm1110_vm10, %v1023_v46, 0.0  ;;  %v1191_v40 = vmax.f32 %v1189_v25, %v1190_v44  ;;  %v1209_v46 = vmax.f32 %v2276_v1, %v1208_v31  ;;  %v1176_v25 = vrot.slane %v1175_v19, 1 }
 0x2c7   :  { %v1251_v20 = vsel %vm1141_vm8, %v1138_v6, -inf  ;;  %v1247_v6 = vmax.f32 %v1245_v34, %v1246_v33 }
 0x2c8   :  { %v1252_v49 = vmax.f32 %v1250_v7, %v1251_v20  ;;  %v1192_v16 = vrot.slane %v1191_v40, 2  ;;  %v1184_v7 = vmax.f32 %v1182_v12, %v1183_v2  ;;  %v1210_v32 = vrot.slane %v1209_v46, 2 }
 0x2c9   :  { %v992_v24 = vpop.f32.mrf.mxu3  ;;  %v1248_v26 = vrot.slane %v1247_v6, 1  ;;  %v1177_v34 = vmax.f32 %v1175_v19, %v1176_v25 }
 0x2ca   :  { %v950_v23 = vpop.f32.mrf.mxu1  ;;  %v1253_v53 = vrot.slane %v1252_v49, 4  ;;  %v993_v54 = vadd.f32 %v2203_v4, %v992_v24  ;;  %v1193_v24 = vmax.f32 %v1191_v40, %v1192_v16  ;;  %v1185_v27 = vrot.slane %v1184_v7, 1 }
 0x2cb   :  { %v951_v43 = vadd.f32 %v2203_v4, %v950_v23  ;;  %v1211_v39 = vmax.f32 %v1209_v46, %v1210_v32  ;;  %v1249_v44 = vmax.f32 %v1247_v6, %v1248_v26  ;;  %v1353_v26 = vsel %vm1083_vm6, 12, %v1576_v9 }
 0x2cc   :  { %v1254_v36 = vmax.f32 %v1252_v49, %v1253_v53  ;;  %v1024_v30 = vmax.f32 %v993_v54, 0.0 }
 0x2cd   :  { %v1010_v48 = vmax.f32 %v951_v43, 0.0  ;;  %v1212_v52 = vrot.slane %v1211_v39, 1 }
 0x2ce   :  { %v1255_v21 = vrot.slane %v1254_v36, 2  ;;  %v1259_v47 = vsel %vm1141_vm8, %v1024_v30, -inf  ;;  %v1272_v30 = vsel %vm1271_vm13, %v2293_v35, %v1177_v34 }
 0x2cf   :  { %v1196_v20 = vsel %vm1141_vm8, %v1010_v48, -inf  ;;  %v1213_v10 = vmax.f32 %v1211_v39, %v1212_v52 }
 0x2d0   :  { %v1256_v1 = vmax.f32 %v1254_v36, %v1255_v21  ;;  %v1186_v36 = vmax.f32 %v1184_v7, %v1185_v27 }
 0x2d1   :  { %v995_v61 = vpop.f32.mrf.mxu3 }
 0x2d2   :  { %v996_v63 = vadd.f32 %v2203_v4, %v995_v61  ;;  %v1257_v37 = vrot.slane %v1256_v1, 1 }
 0x2d3   :  { %v953_v45 = vpop.f32.mrf.mxu1 }
 0x2d4   :  { %v1025_v59 = vmax.f32 %v996_v63, 0.0  ;;  %v954_v8 = vadd.f32 %v2203_v4, %v953_v45  ;;  %v1238_v4 = vmax.f32 %v1236_v42, %v1237_v3  ;;  %v1194_v42 = vrot.slane %v1193_v24, 1 }
 0x2d5   :  { %v1258_v29 = vmax.f32 %v1256_v1, %v1257_v37 }
 0x2d6   :  { %v1140_v14 = vsel %vm1112_vm11, %v1025_v59, 0.0  ;;  %v1011_v50 = vmax.f32 %v954_v8, 0.0  ;;  %v1239_v49 = vrot.slane %v1238_v4, 1  ;;  %v1195_v31 = vmax.f32 %v1193_v24, %v1194_v42 }
 0x2d7   :  { %v1260_v58 = vsel %vm1141_vm8, %v1140_v14, -inf  ;;  %v1274_v59 = vsel %vm1273_vm14, %v1272_v30, %v1186_v36 }
 0x2d8   :  { %v1261_v56 = vmax.f32 %v1259_v47, %v1260_v58  ;;  %v1126_v15 = vsel %vm1098_vm12, %v1011_v50, 0.0  ;;  %v1240_v55 = vmax.f32 %v1238_v4, %v1239_v49  ;;  %v1276_v21 = vsel %vm1275_vm15, %v1274_v59, %v1195_v31  ;;  %v1311_v47 = vld [vmem:[%s2417_s4] sm:$0xff] }
 0x2d9   :  { %v1197_v13 = vsel %vm1141_vm8, %v1126_v15, -inf  ;;  %v1299_v4 = vrot.slane %v1571_v41, 4  ;;  %1343 = vmatpush.msrb.mxu2 %v1311_v47 }
 0x2da   :  { %v1262_v0 = vrot.slane %v1261_v56, 4  ;;  %v1198_v22 = vmax.f32 %v1196_v20, %v1197_v13  ;;  %v1280_v12 = vsel %vm320_vm0, %v2300_v18, %v1240_v55  ;;  %vm1321_vm0 = vcmask 392192   ;;  %v1377_v20 = vld [vmem:[%s2419_s6 + $0x8] sm:$0xff]  ;;  %v1376_v13 = vld [vmem:[%s2419_s6] sm:$0xff] }
 0x2db   :  { %v1281_v40 = vsel %vm1271_vm13, %v1280_v12, %v1249_v44  ;;  %1399 = vmatpush.msra.mxu2 %v1377_v20 }
 0x2dc   :  { %v1263_v23 = vmax.f32 %v1261_v56, %v1262_v0  ;;  %v1199_v28 = vrot.slane %v1198_v22, 4  ;;  %v1282_v45 = vsel %vm1273_vm14, %v1281_v40, %v1258_v29 }
 0x2dd   :  { %1400 = vmatpush.msra.mxu2 %v1376_v13 }
 0x2de   :  { %v1264_v51 = vrot.slane %v1263_v23, 2  ;;  %v1200_v53 = vmax.f32 %v1198_v22, %v1199_v28 }
 0x2e0   :  { %v1265_v54 = vmax.f32 %v1263_v23, %v1264_v51  ;;  %v1201_v62 = vrot.slane %v1200_v53, 2 }
 0x2e2   :  { %v1266_v43 = vrot.slane %v1265_v54, 1  ;;  %v1202_v61 = vmax.f32 %v1200_v53, %v1201_v62 }
 0x2e4   :  { %v1267_v63 = vmax.f32 %v1265_v54, %v1266_v43  ;;  %v1203_v3 = vrot.slane %v1202_v61, 1 }
 0x2e6   :  { %v1204_v33 = vmax.f32 %v1202_v61, %v1203_v3  ;;  %v1283_v8 = vsel %vm1275_vm15, %v1282_v45, %v1267_v63 }
 0x2e7   :  { %v1284_v48 = vsel %vm596_vm2, %v1283_v8, 0.0 }
 0x2e8   :  { %v1288_v11 = vrot.slane %v1284_v48, 2  ;;  %v1277_v5 = vsel %vm596_vm2, %v1276_v21, %v1204_v33  ;;  %v1297_v2 = vrot.slane %v1284_v48, 4 }
 0x2e9   :  { %v1278_v18 = vsel %vm454_vm3, %v1277_v5, %v1213_v10  ;;  %vm1405_vm3 = vcmask 25600  }
 0x2ea   :  { %1292 = vrot.lane.b32.xlu2 %v1288_v11, %s1575_s20  ;;  %v1296_v46 = vrot.slane %v1278_v18, 4  ;;  %v1287_v35 = vrot.slane %v1278_v18, 2  ;;  %v1300_v16 = vsel %vm1273_vm14, %v1297_v2, %v1299_v4 }
 0x2ec   :  { %v1298_v14 = vsel %vm1273_vm14, %v1296_v46, %v1297_v2  ;;  %v1289_v50 = vsel %vm596_vm2, %v1287_v35, %v1288_v11  ;;  %vm1355_vm2 = vcmp.lt.s32.totalorder %v2206_v57, %v1353_v26 }
 0x2ed   :  { %1301 = vrot.lane.b32.xlu1 %v1298_v14, %s1573_s30  ;;  %1290 = vrot.lane.b32.xlu0 %v1289_v50, %s1575_s20 }
 0x2f5   :  { %1303 = vrot.lane.b32.xlu0 %v1300_v16, %s1573_s30 }
 0x344   :  { %v1293_v15 = vpop.permute.xlu2 %1292 }
 0x345   :  { %v1308_v41 = vsel %vm1141_vm8, %v1284_v48, %v1293_v15 }
 0x35f   :  { %v1302_v58 = vpop.permute.xlu1 %1301  ;;  %v1291_v17 = vpop.permute.xlu0 %1290 }
 0x360   :  { %v1307_v6 = vsel %vm1141_vm8, %v1278_v18, %v1291_v17 }
 0x361   :  { %v1309_v56 = vsel %vm738_vm1, %v1307_v6, %v1302_v58 }
 0x362   :  { %1508 = vmatmul.msk.f32.vlgmr.msrb.gmra.mxu2 %vm1321_vm0, %v1309_v56 }
 0x367   :  { %v1304_v19 = vpop.permute.xlu0 %1303 }
 0x368   :  { %v1310_v1 = vsel %vm738_vm1, %v1308_v41, %v1304_v19 }
 0x36a   :  { %1509 = vmatmul.msk.f32.gmra.mxu2 %vm1321_vm0, %v1310_v1 }
 0x3e5   :  { %v1345_v7 = vpop.f32.mrf.mxu2 }
 0x3e6   :  { %v1346_v0 = vadd.f32 %v1542_v60, %v1345_v7 }
 0x3e8   :  { %v1351_v22 = vmax.f32 %v1346_v0, 0.0 }
 0x3ea   :  { %v1359_v32 = vrot.slane %v1351_v22, 2  ;;  %v1362_v24 = vrot.slane %v1351_v22, 4  ;;  %v1365_v28 = vrot.slane %v1351_v22, 6 }
 0x3ec   :  { %v1361_v49 = vmax.f32 %v1351_v22, %v1359_v32 }
 0x3ed   :  { %v1348_v23 = vpop.f32.mrf.mxu2 }
 0x3ee   :  { %v1349_v25 = vadd.f32 %v1542_v60, %v1348_v23  ;;  %v1364_v37 = vmax.f32 %v1361_v49, %v1362_v24 }
 0x3f0   :  { %v1352_v27 = vmax.f32 %v1349_v25, 0.0  ;;  %v1367_v51 = vmax.f32 %v1364_v37, %v1365_v28 }
 0x3f2   :  { %v1357_v53 = vsel %vm1355_vm2, %v1352_v27, 0.0 }
 0x3f3   :  { %v1368_v39 = vmax.f32 %v1367_v51, %v1357_v53  ;;  %v1370_v55 = vrot.slane %v1357_v53, 2  ;;  %v1373_v44 = vrot.slane %v1357_v53, 4 }
 0x3f5   :  { %v1372_v42 = vmax.f32 %v1368_v39, %v1370_v55 }
 0x3f7   :  { %v1375_v54 = vmax.f32 %v1372_v42, %v1373_v44 }
 0x3f9   :  { %1510 = vmatmul.msk.f32.vlgmr.msra.gmra.mxu2 %vm1141_vm8, %v1375_v54 }
 0x47c   :  { %v1402_v57 = vpop.f32.mrf.mxu2 }
 0x47d   :  { %v1403_v62 = vadd.f32 %v1543_v38, %v1402_v57 }
 0x47f   :  { %1406 = vst.msk [vmem:[#allocation2] sm:$0x3] %vm1405_vm3, %v1403_v62 }
 0x480   :  { %1417 = dma.vmem_to_hbm [thread:$0]  %s1413_s27, 32, %s1415_s9, [#allocation3]  }
 0x481   :  { %1568 = dma.done.wait [#allocation3], 32  }
 0x482   :  { %1569 = vsyncadd [#allocation3], 4294967264 }
 0x483   :  { %1422 = vsyncpa [#allocation3], 1 }

</bundles_post_ra>
